<compile_context>
chip_gen: v7x
topology: tpu7x:2x2x1
jax: 0.10.0
libtpu: 0.0.40
codegen_flags: <defaults>
</compile_context>

<pallas_src>
import jax
import jax.numpy as jnp
from jax.experimental import pallas as pl
from jax.experimental.pallas import tpu as pltpu


def _round_up(n, m):
    return ((n + m - 1) // m) * m


def _relu(v):
    return jnp.maximum(v, 0.0)


def _pad2(a, rows, cols):
    r, c = a.shape
    return jnp.pad(a, ((0, rows - r), (0, cols - c)))


# --------------------------------------------------------------------------
# Kernel
# --------------------------------------------------------------------------
def vcl_vae_kernel(
    x_ref,
    # encoder params (pre-transposed to [in, out], bf16; biases [1, out], f32)
    w1, b1, w2, b2, w3, b3,
    whead, bhead,                      # fused mean|rho head: [hidden, 2*Lp]
    # latent noise eps ~ N(0,1), shape [TB, Lp] (zero in padded lanes), f32
    eps_ref,
    # decoder params (already-sampled MeanFieldLinear weights)
    wd1, bd1, wd2, bd2, wd3, bd3, wd4, bd4,
    # outputs
    logits_ref, zstats_ref,
):
    f32 = jnp.float32
    wdt = w1.dtype                     # MXU compute dtype (bfloat16)

    x = x_ref[...].astype(wdt)         # already bf16: no-op cast

    # ---------------- encoder MLP ----------------
    h = _relu(jnp.dot(x, w1[...], preferred_element_type=f32) + b1[...])
    h = _relu(jnp.dot(h.astype(wdt), w2[...], preferred_element_type=f32) + b2[...])
    h = _relu(jnp.dot(h.astype(wdt), w3[...], preferred_element_type=f32) + b3[...])

    # Fused mean/rho head -> single lane-dense [TB, 2*Lp] output.
    zstats = jnp.dot(h.astype(wdt), whead[...], preferred_element_type=f32) + bhead[...]
    zstats_ref[...] = zstats

    lp = eps_ref.shape[-1]             # padded latent width (multiple of 128)
    z_mean = zstats[:, :lp]
    z_rho = zstats[:, lp:]

    # ------------- reparameterization -------------
    z = z_mean + jnp.exp(0.5 * z_rho) * eps_ref[...]

    # ---------------- decoder MLP ----------------
    hd = _relu(jnp.dot(z.astype(wdt), wd1[...], preferred_element_type=f32) + bd1[...])
    hd = _relu(jnp.dot(hd.astype(wdt), wd2[...], preferred_element_type=f32) + bd2[...])
    hd = _relu(jnp.dot(hd.astype(wdt), wd3[...], preferred_element_type=f32) + bd3[...])
    # n_samples == 1 -> accumulated_logits / 1 == logits
    out = jnp.dot(hd.astype(wdt), wd4[...], preferred_element_type=f32) + bd4[...]
    logits_ref[...] = out.astype(logits_ref.dtype)


# --------------------------------------------------------------------------
# One-time weight preparation (cacheable across forward calls).
# --------------------------------------------------------------------------
def prepare_padded_params(params, input_size, hidden_size, latent_size,
                          weight_dtype=jnp.bfloat16):
    """Pads hidden/latent dims to multiples of 128, fuses the mean/rho heads,
    casts weights to bf16.  Call ONCE and reuse the result; only the decoder's
    stochastic MeanFieldLinear sampling has to stay per-call (re-run this on the
    freshly sampled decoder weights if you resample them)."""
    hp = _round_up(hidden_size, 128)
    lp = _round_up(latent_size, 128)

    def w(a, r, c):
        return _pad2(a, r, c).astype(weight_dtype)

    def b(a, c):
        return _pad2(a, 1, c).astype(jnp.float32)

    whead = jnp.concatenate(
        [_pad2(params["wm"], hidden_size, lp),
         _pad2(params["wr"], hidden_size, lp)], axis=1)
    bhead = jnp.concatenate(
        [_pad2(params["bm"], 1, lp), _pad2(params["br"], 1, lp)], axis=1)

    padded = dict(
        # input dim of w1 and output dim of wd4/bd4 are kept UNPADDED
        # (x / logits use their true feature dim).
        w1=w(params["w1"], input_size, hp), b1=b(params["b1"], hp),
        w2=w(params["w2"], hp, hp), b2=b(params["b2"], hp),
        w3=w(params["w3"], hp, hp), b3=b(params["b3"], hp),
        whead=_pad2(whead, hp, 2 * lp).astype(weight_dtype),
        bhead=bhead.astype(jnp.float32),
        wd1=w(params["wd1"], lp, hp), bd1=b(params["bd1"], hp),
        wd2=w(params["wd2"], hp, hp), bd2=b(params["bd2"], hp),
        wd3=w(params["wd3"], hp, hp), bd3=b(params["bd3"], hp),
        wd4=w(params["wd4"], hp, input_size), bd4=b(params["bd4"], input_size),
    )
    return padded, (input_size, hp, lp)


# --------------------------------------------------------------------------
# Forward wrapper (jit this whole function once; see __main__).
# --------------------------------------------------------------------------
def vcl_vae_forward(x, padded_params, eps_z, *, latent_size, block_b=512,
                    vmem_limit_bytes=64 * 1024 * 1024,
                    logits_dtype=jnp.float32):
    """VCL_VAE forward (n_samples=1) in one batch-tiled Pallas kernel.

    block_b guidance:
      v5e (128 MiB VMEM): ~512.
      v6e (128 MiB VMEM): 512-1024 (with vmem_limit_bytes >= 64 MiB).
      v7x (64 MiB VMEM / TC): 256-512; keep >= 4 grid steps for the 2 TCs.
    For tiny demo batches any multiple of 8 works.
    """
    pp = padded_params
    B, input_size = x.shape
    hp = pp["w1"].shape[1]
    lp = pp["whead"].shape[1] // 2

    b8 = _round_up(B, 8)
    tb = min(block_b, b8)
    # When the batch is large enough, cap the tile so the 1-D grid has >= 4
    # steps (megacore sharding on v7x + pipeline overlap), never below 256.
    if b8 >= 4 * 256:
        tb = min(tb, max(256, _round_up(b8 // 4, 8)))
    bp = _round_up(B, tb)
    grid = (bp // tb,)

    # Pad batch rows only; cast x to bf16 in the same pass (halves x DMA bytes).
    x_p = jnp.pad(x, ((0, bp - B), (0, 0))).astype(jnp.bfloat16)
    eps_p = jnp.pad(eps_z, ((0, bp - B), (0, lp - latent_size))).astype(jnp.float32)

    enc_names = ["w1", "b1", "w2", "b2", "w3", "b3", "whead", "bhead"]
    dec_names = ["wd1", "bd1", "wd2", "bd2", "wd3", "bd3", "wd4", "bd4"]
    enc_weights = [pp[n] for n in enc_names]
    dec_weights = [pp[n] for n in dec_names]

    def act_spec(cols):
        # activation tiles: blocked on batch, double-buffered across the grid
        return pl.BlockSpec((tb, cols), lambda i: (i, 0))

    def resident_spec(arr):
        # weights: constant block index + single buffer -> one VMEM copy,
        # resident across all grid steps.
        nd = arr.ndim
        return pl.BlockSpec(arr.shape, lambda i, _nd=nd: (0,) * _nd,
                            pipeline_mode=pl.Buffered(1))

    in_specs = (
        [act_spec(input_size)]
        + [resident_spec(a) for a in enc_weights]
        + [act_spec(lp)]
        + [resident_spec(a) for a in dec_weights]
    )
    out_specs = (act_spec(input_size), act_spec(2 * lp))
    out_shapes = (
        jax.ShapeDtypeStruct((bp, input_size), logits_dtype),  # logits
        jax.ShapeDtypeStruct((bp, 2 * lp), jnp.float32),       # [z_mean | z_rho]
    )

    # Advisory cost estimate so XLA schedules surrounding ops around the call.
    mm_dims = [(input_size, hp), (hp, hp), (hp, hp), (hp, 2 * lp),
               (lp, hp), (hp, hp), (hp, hp), (hp, input_size)]
    flops = 2 * bp * sum(k * n for k, n in mm_dims)
    weight_bytes = sum(int(a.size) * a.dtype.itemsize
                       for a in enc_weights + dec_weights)
    act_bytes = (x_p.size * x_p.dtype.itemsize
                 + eps_p.size * 4
                 + bp * input_size * jnp.dtype(logits_dtype).itemsize
                 + bp * 2 * lp * 4)
    cost = pl.CostEstimate(flops=int(flops),
                           transcendentals=int(bp * lp),
                           bytes_accessed=int(weight_bytes + act_bytes))

    logits_p, zstats_p = pl.pallas_call(
        vcl_vae_kernel,
        grid=grid,
        in_specs=in_specs,
        out_specs=out_specs,
        out_shape=out_shapes,
        compiler_params=pltpu.CompilerParams(
            dimension_semantics=("parallel",),
            vmem_limit_bytes=int(vmem_limit_bytes),
        ),
        cost_estimate=cost,
    )(x_p, *enc_weights, eps_p, *dec_weights)

    logits = logits_p[:B, :]
    z_mean = zstats_p[:B, :latent_size]
    z_rho = zstats_p[:B, lp:lp + latent_size]
    return logits, z_mean, z_rho


# --------------------------------------------------------------------------
# Parameter init mirroring the PyTorch module's __init__ (decoder weights are
# the already-sampled MeanFieldLinear weights W = W_mu + init_std * eps).
# --------------------------------------------------------------------------
def init_params(key, input_size, hidden_size, latent_size, init_std=0.001):
    ks = jax.random.split(key, 16)
    f32 = jnp.float32

    def kaiming_in_out(k, fan_in, fan_out):
        std = (2.0 / fan_in) ** 0.5
        return jax.random.normal(k, (fan_in, fan_out), f32) * std

    def xavier_in_out(k, fan_in, fan_out):
        std = (2.0 / (fan_in + fan_out)) ** 0.5
        return jax.random.normal(k, (fan_in, fan_out), f32) * std

    def zeros_bias(n):
        return jnp.zeros((1, n), f32)

    p = {
        "w1": kaiming_in_out(ks[0], input_size, hidden_size), "b1": zeros_bias(hidden_size),
        "w2": kaiming_in_out(ks[1], hidden_size, hidden_size), "b2": zeros_bias(hidden_size),
        "w3": kaiming_in_out(ks[2], hidden_size, hidden_size), "b3": zeros_bias(hidden_size),
        "wm": xavier_in_out(ks[3], hidden_size, latent_size), "bm": zeros_bias(latent_size),
        "wr": xavier_in_out(ks[4], hidden_size, latent_size), "br": zeros_bias(latent_size),
    }

    def meanfield_sampled(k, fan_in, fan_out):
        km, ke_w, ke_b = jax.random.split(k, 3)
        w_mu = jax.random.normal(km, (fan_in, fan_out), f32) * 0.1
        b_mu = jnp.zeros((1, fan_out), f32)
        w = w_mu + init_std * jax.random.normal(ke_w, (fan_in, fan_out), f32)
        b = b_mu + init_std * jax.random.normal(ke_b, (1, fan_out), f32)
        return w, b

    p["wd1"], p["bd1"] = meanfield_sampled(ks[5], latent_size, hidden_size)
    p["wd2"], p["bd2"] = meanfield_sampled(ks[6], hidden_size, hidden_size)
    p["wd3"], p["bd3"] = meanfield_sampled(ks[7], hidden_size, hidden_size)
    p["wd4"], p["bd4"] = meanfield_sampled(ks[8], hidden_size, input_size)
    return p


if __name__ == "__main__":
    # Small, deliberately lane-unaligned shapes (scaled down from 784/500/50)
    # to exercise padding + the batch-tiled grid (3 grid steps with block_b=8).
    B, INPUT, HIDDEN, LATENT = 24, 200, 120, 40

    key = jax.random.PRNGKey(0)
    k_x, k_p, k_eps = jax.random.split(key, 3)

    x = jax.random.uniform(k_x, (B, INPUT), jnp.float32)
    params = init_params(k_p, INPUT, HIDDEN, LATENT, init_std=0.001)
    eps_z = jax.random.normal(k_eps, (B, LATENT), jnp.float32)

    # Pad/cast/fuse weights ONCE (cached across forward calls).
    padded, _dims = prepare_padded_params(params, INPUT, HIDDEN, LATENT)

    # One jit around the whole wrapper (pad+cast of x/eps fuse with the call).
    fwd = jax.jit(
        vcl_vae_forward,
        static_argnames=("latent_size", "block_b", "vmem_limit_bytes",
                         "logits_dtype"),
    )
    logits, z_mean, z_rho = fwd(x, padded, eps_z, latent_size=LATENT, block_b=8)
    jax.block_until_ready((logits, z_mean, z_rho))

    # Pure-JAX reference reproducing the same math (bf16 weights/activations on
    # the MXU, f32 accumulation), for a tight correctness check.
    def ref(x, p, eps):
        bf = jnp.bfloat16

        def mm(a, w):
            return jnp.dot(a.astype(bf), w.astype(bf),
                           preferred_element_type=jnp.float32)

        h = jnp.maximum(mm(x, p["w1"]) + p["b1"], 0.0)
        h = jnp.maximum(mm(h, p["w2"]) + p["b2"], 0.0)
        h = jnp.maximum(mm(h, p["w3"]) + p["b3"], 0.0)
        zm = mm(h, p["wm"]) + p["bm"]
        zr = mm(h, p["wr"]) + p["br"]
        z = zm + jnp.exp(0.5 * zr) * eps
        hd = jnp.maximum(mm(z, p["wd1"]) + p["bd1"], 0.0)
        hd = jnp.maximum(mm(hd, p["wd2"]) + p["bd2"], 0.0)
        hd = jnp.maximum(mm(hd, p["wd3"]) + p["bd3"], 0.0)
        return mm(hd, p["wd4"]) + p["bd4"], zm, zr

    rl, rm, rr = ref(x, params, eps_z)
    assert jnp.allclose(z_mean, rm, atol=1e-2, rtol=1e-2), "z_mean mismatch"
    assert jnp.allclose(z_rho, rr, atol=1e-2, rtol=1e-2), "z_rho mismatch"
    assert jnp.allclose(logits, rl, atol=2e-2, rtol=2e-2), "logits mismatch"

    print("KERNEL_OK")
</pallas_src>

<mosaic_0001>
module attributes {stable_mosaic.version = 11 : i64} {
  func.func @vcl_vae_kernel(%arg0: i32, %arg1: memref<8x200xbf16, #tpu.memory_space<vmem>>, %arg2: memref<200x128xbf16, #tpu.memory_space<vmem>>, %arg3: memref<1x128xf32, #tpu.memory_space<vmem>>, %arg4: memref<128x128xbf16, #tpu.memory_space<vmem>>, %arg5: memref<1x128xf32, #tpu.memory_space<vmem>>, %arg6: memref<128x128xbf16, #tpu.memory_space<vmem>>, %arg7: memref<1x128xf32, #tpu.memory_space<vmem>>, %arg8: memref<128x256xbf16, #tpu.memory_space<vmem>>, %arg9: memref<1x256xf32, #tpu.memory_space<vmem>>, %arg10: memref<8x128xf32, #tpu.memory_space<vmem>>, %arg11: memref<128x128xbf16, #tpu.memory_space<vmem>>, %arg12: memref<1x128xf32, #tpu.memory_space<vmem>>, %arg13: memref<128x128xbf16, #tpu.memory_space<vmem>>, %arg14: memref<1x128xf32, #tpu.memory_space<vmem>>, %arg15: memref<128x128xbf16, #tpu.memory_space<vmem>>, %arg16: memref<1x128xf32, #tpu.memory_space<vmem>>, %arg17: memref<128x200xbf16, #tpu.memory_space<vmem>>, %arg18: memref<1x200xf32, #tpu.memory_space<vmem>>, %arg19: memref<8x200xf32, #tpu.memory_space<vmem>>, %arg20: memref<8x256xf32, #tpu.memory_space<vmem>>) attributes {dimension_semantics = [#tpu.dimension_semantics<parallel>], iteration_bounds = array<i64: 3>, scalar_prefetch = 0 : i64, scratch_operands = 0 : i64, tpu.core_type = #tpu.core_type<tc>, window_params = [{transform_indices = @transform_0, window_bounds = array<i64: 8, 200>}, {pipeline_mode = #tpu.pipeline_mode<synchronous>, transform_indices = @transform_1, window_bounds = array<i64: 200, 128>}, {pipeline_mode = #tpu.pipeline_mode<synchronous>, transform_indices = @transform_2, window_bounds = array<i64: 1, 128>}, {pipeline_mode = #tpu.pipeline_mode<synchronous>, transform_indices = @transform_3, window_bounds = array<i64: 128, 128>}, {pipeline_mode = #tpu.pipeline_mode<synchronous>, transform_indices = @transform_4, window_bounds = array<i64: 1, 128>}, {pipeline_mode = #tpu.pipeline_mode<synchronous>, transform_indices = @transform_5, window_bounds = array<i64: 128, 128>}, {pipeline_mode = #tpu.pipeline_mode<synchronous>, transform_indices = @transform_6, window_bounds = array<i64: 1, 128>}, {pipeline_mode = #tpu.pipeline_mode<synchronous>, transform_indices = @transform_7, window_bounds = array<i64: 128, 256>}, {pipeline_mode = #tpu.pipeline_mode<synchronous>, transform_indices = @transform_8, window_bounds = array<i64: 1, 256>}, {transform_indices = @transform_9, window_bounds = array<i64: 8, 128>}, {pipeline_mode = #tpu.pipeline_mode<synchronous>, transform_indices = @transform_10, window_bounds = array<i64: 128, 128>}, {pipeline_mode = #tpu.pipeline_mode<synchronous>, transform_indices = @transform_11, window_bounds = array<i64: 1, 128>}, {pipeline_mode = #tpu.pipeline_mode<synchronous>, transform_indices = @transform_12, window_bounds = array<i64: 128, 128>}, {pipeline_mode = #tpu.pipeline_mode<synchronous>, transform_indices = @transform_13, window_bounds = array<i64: 1, 128>}, {pipeline_mode = #tpu.pipeline_mode<synchronous>, transform_indices = @transform_14, window_bounds = array<i64: 128, 128>}, {pipeline_mode = #tpu.pipeline_mode<synchronous>, transform_indices = @transform_15, window_bounds = array<i64: 1, 128>}, {pipeline_mode = #tpu.pipeline_mode<synchronous>, transform_indices = @transform_16, window_bounds = array<i64: 128, 200>}, {pipeline_mode = #tpu.pipeline_mode<synchronous>, transform_indices = @transform_17, window_bounds = array<i64: 1, 200>}, {transform_indices = @transform_18, window_bounds = array<i64: 8, 200>}, {transform_indices = @transform_19, window_bounds = array<i64: 8, 256>}]} {
    %c0 = arith.constant 0 : index
    %c0_0 = arith.constant 0 : index
    %0 = vector.load %arg1[%c0, %c0_0] : memref<8x200xbf16, #tpu.memory_space<vmem>>, vector<8x200xbf16>
    %c0_1 = arith.constant 0 : index
    %c0_2 = arith.constant 0 : index
    %1 = vector.load %arg2[%c0_1, %c0_2] : memref<200x128xbf16, #tpu.memory_space<vmem>>, vector<200x128xbf16>
    %cst = arith.constant dense<0.000000e+00> : vector<8x128xf32>
    %2 = tpu.matmul %0, %1, %cst {dimension_numbers = #tpu.dot_dimension_numbers<[1], [0], [0], [1], [0, 0, 1, 1], [], []>} : vector<8x200xbf16>, vector<200x128xbf16>, vector<8x128xf32> -> vector<8x128xf32>
    %c0_3 = arith.constant 0 : index
    %c0_4 = arith.constant 0 : index
    %3 = vector.load %arg3[%c0_3, %c0_4] : memref<1x128xf32, #tpu.memory_space<vmem>>, vector<1x128xf32>
    %4 = vector.broadcast %3 : vector<1x128xf32> to vector<8x128xf32>
    %5 = arith.addf %2, %4 : vector<8x128xf32>
    %cst_5 = arith.constant 0.000000e+00 : f32
    %6 = vector.broadcast %cst_5 : f32 to vector<8x128xf32>
    %7 = arith.maximumf %5, %6 : vector<8x128xf32>
    %8 = arith.truncf %7 : vector<8x128xf32> to vector<8x128xbf16>
    %c0_6 = arith.constant 0 : index
    %c0_7 = arith.constant 0 : index
    %9 = vector.load %arg4[%c0_6, %c0_7] : memref<128x128xbf16, #tpu.memory_space<vmem>>, vector<128x128xbf16>
    %cst_8 = arith.constant dense<0.000000e+00> : vector<8x128xf32>
    %10 = tpu.matmul %8, %9, %cst_8 {dimension_numbers = #tpu.dot_dimension_numbers<[1], [0], [0], [1], [0, 0, 1, 1], [], []>} : vector<8x128xbf16>, vector<128x128xbf16>, vector<8x128xf32> -> vector<8x128xf32>
    %c0_9 = arith.constant 0 : index
    %c0_10 = arith.constant 0 : index
    %11 = vector.load %arg5[%c0_9, %c0_10] : memref<1x128xf32, #tpu.memory_space<vmem>>, vector<1x128xf32>
    %12 = vector.broadcast %11 : vector<1x128xf32> to vector<8x128xf32>
    %13 = arith.addf %10, %12 : vector<8x128xf32>
    %cst_11 = arith.constant 0.000000e+00 : f32
    %14 = vector.broadcast %cst_11 : f32 to vector<8x128xf32>
    %15 = arith.maximumf %13, %14 : vector<8x128xf32>
    %16 = arith.truncf %15 : vector<8x128xf32> to vector<8x128xbf16>
    %c0_12 = arith.constant 0 : index
    %c0_13 = arith.constant 0 : index
    %17 = vector.load %arg6[%c0_12, %c0_13] : memref<128x128xbf16, #tpu.memory_space<vmem>>, vector<128x128xbf16>
    %cst_14 = arith.constant dense<0.000000e+00> : vector<8x128xf32>
    %18 = tpu.matmul %16, %17, %cst_14 {dimension_numbers = #tpu.dot_dimension_numbers<[1], [0], [0], [1], [0, 0, 1, 1], [], []>} : vector<8x128xbf16>, vector<128x128xbf16>, vector<8x128xf32> -> vector<8x128xf32>
    %c0_15 = arith.constant 0 : index
    %c0_16 = arith.constant 0 : index
    %19 = vector.load %arg7[%c0_15, %c0_16] : memref<1x128xf32, #tpu.memory_space<vmem>>, vector<1x128xf32>
    %20 = vector.broadcast %19 : vector<1x128xf32> to vector<8x128xf32>
    %21 = arith.addf %18, %20 : vector<8x128xf32>
    %cst_17 = arith.constant 0.000000e+00 : f32
    %22 = vector.broadcast %cst_17 : f32 to vector<8x128xf32>
    %23 = arith.maximumf %21, %22 : vector<8x128xf32>
    %24 = arith.truncf %23 : vector<8x128xf32> to vector<8x128xbf16>
    %c0_18 = arith.constant 0 : index
    %c0_19 = arith.constant 0 : index
    %25 = vector.load %arg8[%c0_18, %c0_19] : memref<128x256xbf16, #tpu.memory_space<vmem>>, vector<128x256xbf16>
    %cst_20 = arith.constant dense<0.000000e+00> : vector<8x256xf32>
    %26 = tpu.matmul %24, %25, %cst_20 {dimension_numbers = #tpu.dot_dimension_numbers<[1], [0], [0], [1], [0, 0, 1, 1], [], []>} : vector<8x128xbf16>, vector<128x256xbf16>, vector<8x256xf32> -> vector<8x256xf32>
    %c0_21 = arith.constant 0 : index
    %c0_22 = arith.constant 0 : index
    %27 = vector.load %arg9[%c0_21, %c0_22] : memref<1x256xf32, #tpu.memory_space<vmem>>, vector<1x256xf32>
    %28 = vector.broadcast %27 : vector<1x256xf32> to vector<8x256xf32>
    %29 = arith.addf %26, %28 : vector<8x256xf32>
    %c0_23 = arith.constant 0 : index
    %c0_24 = arith.constant 0 : index
    %30 = vector.load %arg20[%c0_23, %c0_24] : memref<8x256xf32, #tpu.memory_space<vmem>>, vector<8x256xf32>
    tpu.vector_store %arg20[%c0_23, %c0_24], %29 {strides = array<i32>} : memref<8x256xf32, #tpu.memory_space<vmem>>, vector<8x256xf32>,
    %31 = vector.extract_strided_slice %29 {offsets = [0, 0], sizes = [8, 128], strides = [1, 1]} : vector<8x256xf32> to vector<8x128xf32>
    %32 = vector.extract_strided_slice %29 {offsets = [0, 128], sizes = [8, 128], strides = [1, 1]} : vector<8x256xf32> to vector<8x128xf32>
    %cst_25 = arith.constant 5.000000e-01 : f32
    %33 = vector.broadcast %cst_25 : f32 to vector<8x128xf32>
    %34 = arith.mulf %33, %32 : vector<8x128xf32>
    %35 = math.exp %34 : vector<8x128xf32>
    %c0_26 = arith.constant 0 : index
    %c0_27 = arith.constant 0 : index
    %36 = vector.load %arg10[%c0_26, %c0_27] : memref<8x128xf32, #tpu.memory_space<vmem>>, vector<8x128xf32>
    %37 = arith.mulf %35, %36 : vector<8x128xf32>
    %38 = arith.addf %31, %37 : vector<8x128xf32>
    %39 = arith.truncf %38 : vector<8x128xf32> to vector<8x128xbf16>
    %c0_28 = arith.constant 0 : index
    %c0_29 = arith.constant 0 : index
    %40 = vector.load %arg11[%c0_28, %c0_29] : memref<128x128xbf16, #tpu.memory_space<vmem>>, vector<128x128xbf16>
    %cst_30 = arith.constant dense<0.000000e+00> : vector<8x128xf32>
    %41 = tpu.matmul %39, %40, %cst_30 {dimension_numbers = #tpu.dot_dimension_numbers<[1], [0], [0], [1], [0, 0, 1, 1], [], []>} : vector<8x128xbf16>, vector<128x128xbf16>, vector<8x128xf32> -> vector<8x128xf32>
    %c0_31 = arith.constant 0 : index
    %c0_32 = arith.constant 0 : index
    %42 = vector.load %arg12[%c0_31, %c0_32] : memref<1x128xf32, #tpu.memory_space<vmem>>, vector<1x128xf32>
    %43 = vector.broadcast %42 : vector<1x128xf32> to vector<8x128xf32>
    %44 = arith.addf %41, %43 : vector<8x128xf32>
    %cst_33 = arith.constant 0.000000e+00 : f32
    %45 = vector.broadcast %cst_33 : f32 to vector<8x128xf32>
    %46 = arith.maximumf %44, %45 : vector<8x128xf32>
    %47 = arith.truncf %46 : vector<8x128xf32> to vector<8x128xbf16>
    %c0_34 = arith.constant 0 : index
    %c0_35 = arith.constant 0 : index
    %48 = vector.load %arg13[%c0_34, %c0_35] : memref<128x128xbf16, #tpu.memory_space<vmem>>, vector<128x128xbf16>
    %cst_36 = arith.constant dense<0.000000e+00> : vector<8x128xf32>
    %49 = tpu.matmul %47, %48, %cst_36 {dimension_numbers = #tpu.dot_dimension_numbers<[1], [0], [0], [1], [0, 0, 1, 1], [], []>} : vector<8x128xbf16>, vector<128x128xbf16>, vector<8x128xf32> -> vector<8x128xf32>
    %c0_37 = arith.constant 0 : index
    %c0_38 = arith.constant 0 : index
    %50 = vector.load %arg14[%c0_37, %c0_38] : memref<1x128xf32, #tpu.memory_space<vmem>>, vector<1x128xf32>
    %51 = vector.broadcast %50 : vector<1x128xf32> to vector<8x128xf32>
    %52 = arith.addf %49, %51 : vector<8x128xf32>
    %cst_39 = arith.constant 0.000000e+00 : f32
    %53 = vector.broadcast %cst_39 : f32 to vector<8x128xf32>
    %54 = arith.maximumf %52, %53 : vector<8x128xf32>
    %55 = arith.truncf %54 : vector<8x128xf32> to vector<8x128xbf16>
    %c0_40 = arith.constant 0 : index
    %c0_41 = arith.constant 0 : index
    %56 = vector.load %arg15[%c0_40, %c0_41] : memref<128x128xbf16, #tpu.memory_space<vmem>>, vector<128x128xbf16>
    %cst_42 = arith.constant dense<0.000000e+00> : vector<8x128xf32>
    %57 = tpu.matmul %55, %56, %cst_42 {dimension_numbers = #tpu.dot_dimension_numbers<[1], [0], [0], [1], [0, 0, 1, 1], [], []>} : vector<8x128xbf16>, vector<128x128xbf16>, vector<8x128xf32> -> vector<8x128xf32>
    %c0_43 = arith.constant 0 : index
    %c0_44 = arith.constant 0 : index
    %58 = vector.load %arg16[%c0_43, %c0_44] : memref<1x128xf32, #tpu.memory_space<vmem>>, vector<1x128xf32>
    %59 = vector.broadcast %58 : vector<1x128xf32> to vector<8x128xf32>
    %60 = arith.addf %57, %59 : vector<8x128xf32>
    %cst_45 = arith.constant 0.000000e+00 : f32
    %61 = vector.broadcast %cst_45 : f32 to vector<8x128xf32>
    %62 = arith.maximumf %60, %61 : vector<8x128xf32>
    %63 = arith.truncf %62 : vector<8x128xf32> to vector<8x128xbf16>
    %c0_46 = arith.constant 0 : index
    %c0_47 = arith.constant 0 : index
    %64 = vector.load %arg17[%c0_46, %c0_47] : memref<128x200xbf16, #tpu.memory_space<vmem>>, vector<128x200xbf16>
    %cst_48 = arith.constant dense<0.000000e+00> : vector<8x200xf32>
    %65 = tpu.matmul %63, %64, %cst_48 {dimension_numbers = #tpu.dot_dimension_numbers<[1], [0], [0], [1], [0, 0, 1, 1], [], []>} : vector<8x128xbf16>, vector<128x200xbf16>, vector<8x200xf32> -> vector<8x200xf32>
    %c0_49 = arith.constant 0 : index
    %c0_50 = arith.constant 0 : index
    %66 = vector.load %arg18[%c0_49, %c0_50] : memref<1x200xf32, #tpu.memory_space<vmem>>, vector<1x200xf32>
    %67 = vector.broadcast %66 : vector<1x200xf32> to vector<8x200xf32>
    %68 = arith.addf %65, %67 : vector<8x200xf32>
    %c0_51 = arith.constant 0 : index
    %c0_52 = arith.constant 0 : index
    %69 = vector.load %arg19[%c0_51, %c0_52] : memref<8x200xf32, #tpu.memory_space<vmem>>, vector<8x200xf32>
    tpu.vector_store %arg19[%c0_51, %c0_52], %68 {strides = array<i32>} : memref<8x200xf32, #tpu.memory_space<vmem>>, vector<8x200xf32>,
    return
  }
  func.func @transform_0(%arg0: i32) -> (i32, i32) {
    %c0_i32 = arith.constant 0 : i32
    %c0_i32_0 = arith.constant 0 : i32
    return %arg0, %c0_i32 : i32, i32
  }
  func.func @transform_1(%arg0: i32) -> (i32, i32) {
    %c0_i32 = arith.constant 0 : i32
    %c0_i32_0 = arith.constant 0 : i32
    %c0_i32_1 = arith.constant 0 : i32
    return %c0_i32, %c0_i32_0 : i32, i32
  }
  func.func @transform_2(%arg0: i32) -> (i32, i32) {
    %c0_i32 = arith.constant 0 : i32
    %c0_i32_0 = arith.constant 0 : i32
    %c0_i32_1 = arith.constant 0 : i32
    return %c0_i32, %c0_i32_0 : i32, i32
  }
  func.func @transform_3(%arg0: i32) -> (i32, i32) {
    %c0_i32 = arith.constant 0 : i32
    %c0_i32_0 = arith.constant 0 : i32
    %c0_i32_1 = arith.constant 0 : i32
    return %c0_i32, %c0_i32_0 : i32, i32
  }
  func.func @transform_4(%arg0: i32) -> (i32, i32) {
    %c0_i32 = arith.constant 0 : i32
    %c0_i32_0 = arith.constant 0 : i32
    %c0_i32_1 = arith.constant 0 : i32
    return %c0_i32, %c0_i32_0 : i32, i32
  }
  func.func @transform_5(%arg0: i32) -> (i32, i32) {
    %c0_i32 = arith.constant 0 : i32
    %c0_i32_0 = arith.constant 0 : i32
    %c0_i32_1 = arith.constant 0 : i32
    return %c0_i32, %c0_i32_0 : i32, i32
  }
  func.func @transform_6(%arg0: i32) -> (i32, i32) {
    %c0_i32 = arith.constant 0 : i32
    %c0_i32_0 = arith.constant 0 : i32
    %c0_i32_1 = arith.constant 0 : i32
    return %c0_i32, %c0_i32_0 : i32, i32
  }
  func.func @transform_7(%arg0: i32) -> (i32, i32) {
    %c0_i32 = arith.constant 0 : i32
    %c0_i32_0 = arith.constant 0 : i32
    %c0_i32_1 = arith.constant 0 : i32
    return %c0_i32, %c0_i32_0 : i32, i32
  }
  func.func @transform_8(%arg0: i32) -> (i32, i32) {
    %c0_i32 = arith.constant 0 : i32
    %c0_i32_0 = arith.constant 0 : i32
    %c0_i32_1 = arith.constant 0 : i32
    return %c0_i32, %c0_i32_0 : i32, i32
  }
  func.func @transform_9(%arg0: i32) -> (i32, i32) {
    %c0_i32 = arith.constant 0 : i32
    %c0_i32_0 = arith.constant 0 : i32
    return %arg0, %c0_i32 : i32, i32
  }
  func.func @transform_10(%arg0: i32) -> (i32, i32) {
    %c0_i32 = arith.constant 0 : i32
    %c0_i32_0 = arith.constant 0 : i32
    %c0_i32_1 = arith.constant 0 : i32
    return %c0_i32, %c0_i32_0 : i32, i32
  }
  func.func @transform_11(%arg0: i32) -> (i32, i32) {
    %c0_i32 = arith.constant 0 : i32
    %c0_i32_0 = arith.constant 0 : i32
    %c0_i32_1 = arith.constant 0 : i32
    return %c0_i32, %c0_i32_0 : i32, i32
  }
  func.func @transform_12(%arg0: i32) -> (i32, i32) {
    %c0_i32 = arith.constant 0 : i32
    %c0_i32_0 = arith.constant 0 : i32
    %c0_i32_1 = arith.constant 0 : i32
    return %c0_i32, %c0_i32_0 : i32, i32
  }
  func.func @transform_13(%arg0: i32) -> (i32, i32) {
    %c0_i32 = arith.constant 0 : i32
    %c0_i32_0 = arith.constant 0 : i32
    %c0_i32_1 = arith.constant 0 : i32
    return %c0_i32, %c0_i32_0 : i32, i32
  }
  func.func @transform_14(%arg0: i32) -> (i32, i32) {
    %c0_i32 = arith.constant 0 : i32
    %c0_i32_0 = arith.constant 0 : i32
    %c0_i32_1 = arith.constant 0 : i32
    return %c0_i32, %c0_i32_0 : i32, i32
  }
  func.func @transform_15(%arg0: i32) -> (i32, i32) {
    %c0_i32 = arith.constant 0 : i32
    %c0_i32_0 = arith.constant 0 : i32
    %c0_i32_1 = arith.constant 0 : i32
    return %c0_i32, %c0_i32_0 : i32, i32
  }
  func.func @transform_16(%arg0: i32) -> (i32, i32) {
    %c0_i32 = arith.constant 0 : i32
    %c0_i32_0 = arith.constant 0 : i32
    %c0_i32_1 = arith.constant 0 : i32
    return %c0_i32, %c0_i32_0 : i32, i32
  }
  func.func @transform_17(%arg0: i32) -> (i32, i32) {
    %c0_i32 = arith.constant 0 : i32
    %c0_i32_0 = arith.constant 0 : i32
    %c0_i32_1 = arith.constant 0 : i32
    return %c0_i32, %c0_i32_0 : i32, i32
  }
  func.func @transform_18(%arg0: i32) -> (i32, i32) {
    %c0_i32 = arith.constant 0 : i32
    %c0_i32_0 = arith.constant 0 : i32
    return %arg0, %c0_i32 : i32, i32
  }
  func.func @transform_19(%arg0: i32) -> (i32, i32) {
    %c0_i32 = arith.constant 0 : i32
    %c0_i32_0 = arith.constant 0 : i32
    return %arg0, %c0_i32 : i32, i32
  }
}

</mosaic_0001>

<bundles_post_ra>
// kernel: vcl_vae_forward.1
= control target key start
LH: loop header
LB: loop body
LE: loop exit
PB: predicated region body
PF: predicated region fallthrough
CT: control target
= control target key end

     0   :  { %s4381_s0 = inlined_call_operand.hbm [shape: bf16[24,200], index: 0, kind: input, shape index: {}]   ;;  %s4382_s1 = inlined_call_operand.hbm [shape: bf16[200,128], index: 1, kind: input, shape index: {}]   ;;  %s4383_s2 = inlined_call_operand.hbm [shape: f32[1,128], index: 2, kind: input, shape index: {}]   ;;  %s4384_s3 = inlined_call_operand.hbm [shape: bf16[128,128], index: 3, kind: input, shape index: {}]   ;;  %s4385_s4 = inlined_call_operand.hbm [shape: f32[1,128], index: 4, kind: input, shape index: {}]   ;;  %s4386_s5 = inlined_call_operand.hbm [shape: bf16[128,128], index: 5, kind: input, shape index: {}]   ;;  %s4387_s6 = inlined_call_operand.hbm [shape: f32[1,128], index: 6, kind: input, shape index: {}]   ;;  %s4388_s7 = inlined_call_operand.hbm [shape: bf16[128,256], index: 7, kind: input, shape index: {}]   ;;  %s4389_s8 = inlined_call_operand.hbm [shape: f32[1,256], index: 8, kind: input, shape index: {}]   ;;  %s4390_s9 = inlined_call_operand.hbm [shape: f32[24,128], index: 9, kind: input, shape index: {}]   ;;  %s4391_s10 = inlined_call_operand.hbm [shape: bf16[128,128], index: 10, kind: input, shape index: {}]   ;;  %s4392_s11 = inlined_call_operand.hbm [shape: f32[1,128], index: 11, kind: input, shape index: {}]   ;;  %s4393_s12 = inlined_call_operand.hbm [shape: bf16[128,128], index: 12, kind: input, shape index: {}]   ;;  %s4394_s13 = inlined_call_operand.hbm [shape: f32[1,128], index: 13, kind: input, shape index: {}]   ;;  %s4395_s14 = inlined_call_operand.hbm [shape: bf16[128,128], index: 14, kind: input, shape index: {}]   ;;  %s4396_s15 = inlined_call_operand.hbm [shape: f32[1,128], index: 15, kind: input, shape index: {}]   ;;  %s4397_s16 = inlined_call_operand.hbm [shape: bf16[128,200], index: 16, kind: input, shape index: {}]   ;;  %s4398_s17 = inlined_call_operand.hbm [shape: f32[1,200], index: 17, kind: input, shape index: {}]   ;;  %s4399_s18 = inlined_call_operand.hbm [shape: f32[24,200], index: 18, kind: output, shape index: {0}]   ;;  %s4400_s19 = inlined_call_operand.hbm [shape: f32[24,256], index: 19, kind: output, shape index: {1}]  }
   0x1   :  { %4428 = sst [smem:[#allocation53_spill]] %s4381_s0 }
   0x2   :  { %4429 = sst [smem:[#allocation54_spill]] %s4382_s1 }
   0x3   :  { %4430 = sst [smem:[#allocation55_spill]] %s4383_s2 }
   0x4   :  { %4431 = sst [smem:[#allocation56_spill]] %s4384_s3 }
   0x5   :  { %4432 = sst [smem:[#allocation57_spill]] %s4385_s4 }
   0x6   :  { %4433 = sst [smem:[#allocation58_spill]] %s4386_s5 }
   0x7   :  { %4434 = sst [smem:[#allocation59_spill]] %s4387_s6 }
   0x8   :  { %4435 = sst [smem:[#allocation60_spill]] %s4388_s7 }
   0x9   :  { %4436 = sst [smem:[#allocation61_spill]] %s4389_s8 }
   0xa   :  { %4437 = sst [smem:[#allocation62_spill]] %s4390_s9 }
   0xb   :  { %4438 = sst [smem:[#allocation63_spill]] %s4391_s10 }
   0xc   :  { %4439 = sst [smem:[#allocation64_spill]] %s4392_s11 }
   0xd   :  { %4440 = sst [smem:[#allocation65_spill]] %s4399_s18 }
   0xe   :  { %4441 = sst [smem:[#allocation66_spill]] %s4400_s19 }
   0xf   :  { %25 = vsyncpa [#allocation3], 0 }
  0x10   :  { %27 = vsyncpa [#allocation3 + $0x1], 0 }
  0x11   :  { %28 = vsyncpa [#allocation6], 0 }
  0x12   :  { %29 = vsyncpa [#allocation9], 0 }
  0x13   :  { %30 = vsyncpa [#allocation12], 0 }
  0x14   :  { %31 = vsyncpa [#allocation15], 0 }
  0x15   :  { %32 = vsyncpa [#allocation18], 0 }
  0x16   :  { %34 = vsyncpa [#allocation18 + $0x1], 0 }
  0x17   :  { %35 = vsyncpa [#allocation21], 0 }
  0x18   :  { %36 = vsyncpa [#allocation24], 0 }
  0x19   :  { %37 = vsyncpa [#allocation27], 0 }
  0x1a   :  { %38 = vsyncpa [#allocation30], 0 }
  0x1b   :  { %39 = vsyncpa [#allocation4], 0 }
  0x1c   :  { %41 = vsyncpa [#allocation4 + $0x1], 0 }
  0x1d   :  { %42 = vsyncpa [#allocation33], 0 }
  0x1e   :  { %44 = vsyncpa [#allocation33 + $0x1], 0  ;;  %s3632_s0 = smov 0   ;;  %s3634_s30 = smov 0  }
  0x1f   :  { %s3636_s20 = smov 0   ;;  %s3638_s21 = smov 0  }
  0x20 LB: > { %4442 = sst [smem:[#allocation47_spill]] %s3491_s0  ;;  %s3505_s1 = smov [#allocation5]   ;;  %s3503_s21 = sphi %s3638_s21, %s4056_s21   ;;  %s3499_s20 = sphi %s3636_s20, %s4509_s20   ;;  %s3495_s30 = sphi %s3634_s30, %s4508_s30   ;;  %s3491_s0 = sphi %s3632_s0, %s4507_s0  }
  0x21   : > { %4443 = sst [smem:[#allocation48_spill]] %s3495_s30  ;;  %s507_s22 = sshll.u32 %s3505_s1, 4  ;;  %s3658_s22 = int_to_ptr.vmem [resolvable:$true] %s507_s22 }
  0x22   : > { %4444 = sst [smem:[#allocation49_spill]] %s3499_s20  ;;  %s3653_s2 = sadd.s32 4294967295, %s3503_s21  }
  0x23   : > { %4445 = sst [smem:[#allocation50_spill]] %s3503_s21  ;;  %p2234_p0 = scmp.ge.s32.totalorder %s3503_s21, 1 }
  0x24   : > { %4446 = sst [smem:[#allocation51_spill]] %s3653_s2  ;;  %p4416_p1 = scmp.eq.s32.totalorder %s3653_s2, 0 }
  0x25   : > { %p495_p2 = scmp.lt.s32.totalorder %s3503_s21, 4  ;;  %s3506_s24 = smov [#allocation8]  }
  0x26   : > { %s531_s25 = sshll.u32 %s3506_s24, 4  ;;  %s3507_s26 = smov [#allocation11]   ;;  %s3672_s25 = int_to_ptr.vmem [resolvable:$true] %s531_s25 }
  0x27   : > { %p3660_p3 = pnand %p2234_p0, %p495_p2  ;;  %s555_s27 = sshll.u32 %s3507_s26, 4  ;;  %s3674_s27 = int_to_ptr.vmem [resolvable:$true] %s555_s27 }
  0x28   : > { %s4450_s1 = sld [smem:[#allocation54_spill]] }
  0x29   : > { %s4447_s23 = scalar_select %p3660_p3, 1, 0 }
  0x2a   : > { %p2600_p4 = pneg %p3660_p3 }
  0x2b   : > { %4448 = sst [smem:[#allocation52_spill]] %s4447_s23 }
  0x2c   : > { %p3668_p5 = pnand %p2600_p4, %p4416_p1 }
  0x2e   : > { %s2857_s18 = scalar_lea.hbm %s4450_s1, 1600  ;;  %p3684_p7 = pneg %p3668_p5 }
  0x2f   : > { %p2858_p6 = scmp.ne.s32.totalorder %s4450_s1, %s2857_s18  ;;  %p2864_p10 = scmp.lt.u32.totalorder %s2857_s18, %s4450_s1 }
  0x31   : > { %p2860_p8 = pnand %p3684_p7, %p2858_p6 }
  0x33   : > { %p2861_p9 = pneg %p2860_p8 }
  0x35   : > { %p2866_p11 = pnand %p2864_p10, %p2861_p9 }
  0x37   : > { %2869 = shalt.err (!%p2866_p11)
}
  0x38   : > { %s2870_s19 = scalar_lea.vmem %s3658_s22, 1600  ;;  %p2878_p2 = scmp.lt.s32.totalorder %s3658_s22, %s3658_s22 }
  0x39   : > { %p2871_p12 = scmp.ne.s32.totalorder %s3658_s22, %s2870_s19  ;;  %p2879_p4 = scmp.lt.s32.totalorder %s2870_s19, %s2870_s19 }
  0x3b   : > { %p2873_p13 = pnand %p2871_p12, %p3684_p7  ;;  %p2880_p6 = por %p2879_p4, %p2878_p2 }
  0x3d   : > { %p2874_p0 = pneg %p2873_p13 }
  0x3f   : > { %p2881_p8 = pnand %p2880_p6, %p2874_p0 }
  0x41   : > { %2884 = shalt.err (!%p2881_p8)
}
  0x42   : > { %s4418_s23 = smov 64   ;;  %s4420_s9 = smov 4  }
  0x43   : > { %2603 = dma.hbm_to_vmem [thread:$0]  (!%p3668_p5), %s4450_s1, 1600, %s3658_s22, [#allocation6], %s4418_s23, %s4418_s23, %s4420_s9  }
  0x44   : > { %s4452_s2 = sld [smem:[#allocation56_spill]] }
  0x4a   : > { %s2885_s19 = scalar_lea.hbm %s4452_s2, 1024 }
  0x4b   : > { %p2886_p9 = scmp.ne.s32.totalorder %s4452_s2, %s2885_s19  ;;  %p2892_p12 = scmp.lt.u32.totalorder %s2885_s19, %s4452_s2 }
  0x4d   : > { %p2888_p10 = pnand %p2886_p9, %p3684_p7 }
  0x4f   : > { %p2889_p11 = pneg %p2888_p10 }
  0x51   : > { %p2894_p13 = pnand %p2892_p12, %p2889_p11 }
  0x53   : > { %2897 = shalt.err (!%p2894_p13)
}
  0x54   : > { %s2898_s22 = scalar_lea.vmem %s3672_s25, 1024  ;;  %p2906_p6 = scmp.lt.s32.totalorder %s3672_s25, %s3672_s25 }
  0x55   : > { %p2899_p0 = scmp.ne.s32.totalorder %s3672_s25, %s2898_s22  ;;  %p2907_p8 = scmp.lt.s32.totalorder %s2898_s22, %s2898_s22 }
  0x57   : > { %p2901_p2 = pnand %p2899_p0, %p3684_p7  ;;  %p2908_p9 = por %p2907_p8, %p2906_p6 }
  0x59   : > { %p2902_p4 = pneg %p2901_p2 }
  0x5b   : > { %p2909_p10 = pnand %p2908_p9, %p2902_p4 }
  0x5d   : > { %2912 = shalt.err (!%p2909_p10)
}
  0x5e   : > { %2609 = dma.hbm_to_vmem [thread:$0]  (!%p3668_p5), %s4452_s2, 1024, %s3672_s25, [#allocation9], %s4418_s23, %s4418_s23, %s4420_s9  }
  0x5f   : > { %s4453_s5 = sld [smem:[#allocation58_spill]] }
  0x65   : > { %s2913_s18 = scalar_lea.hbm %s4453_s5, 1024 }
  0x66   : > { %p2914_p11 = scmp.ne.s32.totalorder %s4453_s5, %s2913_s18  ;;  %p2920_p0 = scmp.lt.u32.totalorder %s2913_s18, %s4453_s5 }
  0x68   : > { %p2916_p12 = pnand %p2914_p11, %p3684_p7 }
  0x6a   : > { %p2917_p13 = pneg %p2916_p12 }
  0x6c   : > { %p2922_p2 = pnand %p2920_p0, %p2917_p13 }
  0x6e   : > { %2925 = shalt.err (!%p2922_p2)
}
  0x6f   : > { %s2926_s25 = scalar_lea.vmem %s3674_s27, 1024  ;;  %p2934_p9 = scmp.lt.s32.totalorder %s3674_s27, %s3674_s27 }
  0x70   : > { %p2927_p4 = scmp.ne.s32.totalorder %s3674_s27, %s2926_s25  ;;  %p2935_p10 = scmp.lt.s32.totalorder %s2926_s25, %s2926_s25 }
  0x72   : > { %p2929_p6 = pnand %p2927_p4, %p3684_p7  ;;  %p2936_p11 = por %p2935_p10, %p2934_p9 }
  0x74   : > { %p2930_p8 = pneg %p2929_p6 }
  0x76   : > { %p2937_p12 = pnand %p2936_p11, %p2930_p8 }
  0x78   : > { %2940 = shalt.err (!%p2937_p12)
}
  0x79   : > { %2615 = dma.hbm_to_vmem [thread:$0]  (!%p3668_p5), %s4453_s5, 1024, %s3674_s27, [#allocation12], %s4418_s23, %s4418_s23, %s4420_s9  }
  0x7a   : > { %s3510_s30 = smov [#allocation14]   ;;  %s4454_s7 = sld [smem:[#allocation60_spill]] }
  0x7b   : > { %s579_s20 = sshll.u32 %s3510_s30, 4  ;;  %s580_s20 = int_to_ptr.vmem [resolvable:$true] %s579_s20 }
  0x80   : > { %s2941_s28 = scalar_lea.hbm %s4454_s7, 2048 }
  0x81   : > { %p2942_p13 = scmp.ne.s32.totalorder %s4454_s7, %s2941_s28  ;;  %p2948_p4 = scmp.lt.u32.totalorder %s2941_s28, %s4454_s7 }
  0x83   : > { %p2944_p0 = pnand %p2942_p13, %p3684_p7 }
  0x85   : > { %p2945_p2 = pneg %p2944_p0 }
  0x87   : > { %p2950_p6 = pnand %p2948_p4, %p2945_p2 }
  0x89   : > { %2953 = shalt.err (!%p2950_p6)
}
  0x8a   : > { %s2954_s27 = scalar_lea.vmem %s580_s20, 2048  ;;  %p2962_p11 = scmp.lt.s32.totalorder %s580_s20, %s580_s20 }
  0x8b   : > { %p2955_p8 = scmp.ne.s32.totalorder %s580_s20, %s2954_s27  ;;  %p2963_p12 = scmp.lt.s32.totalorder %s2954_s27, %s2954_s27 }
  0x8d   : > { %p2957_p9 = pnand %p2955_p8, %p3684_p7  ;;  %p2964_p1 = por %p2963_p12, %p2962_p11 }
  0x8f   : > { %p2958_p10 = pneg %p2957_p9 }
  0x91   : > { %p2965_p3 = pnand %p2964_p1, %p2958_p10 }
  0x93   : > { %2968 = shalt.err (!%p2965_p3)
}
  0x94   : > { %s4422_s22 = smov 128   ;;  %s4423_s0 = smov 8  }
  0x95   : > { %2621 = dma.hbm_to_vmem [thread:$0]  (!%p3668_p5), %s4454_s7, 2048, %s580_s20, [#allocation15], %s4422_s22, %s4422_s22, %s4423_s0  }
  0x96   : > { %s3513_s18 = smov [#allocation19]   ;;  %s3514_s29 = smov [#allocation20]  }
  0x97   : > { %s603_s28 = sshll.u32 %s3513_s18, 4  ;;  %s617_s26 = sshll.u32 %s3514_s29, 4  ;;  %s604_s28 = int_to_ptr.vmem [resolvable:$true] %s603_s28  ;;  %s3781_s26 = int_to_ptr.vmem [resolvable:$true] %s617_s26 }
  0x98   : > { %s4455_s10 = sld [smem:[#allocation63_spill]] }
  0x9e   : > { %s2969_s27 = scalar_lea.hbm %s4455_s10, 1024 }
  0x9f   : > { %p2970_p1 = scmp.ne.s32.totalorder %s4455_s10, %s2969_s27  ;;  %p2976_p0 = scmp.lt.u32.totalorder %s2969_s27, %s4455_s10 }
  0xa1   : > { %p2972_p3 = pnand %p2970_p1, %p3684_p7 }
  0xa3   : > { %p2973_p13 = pneg %p2972_p3 }
  0xa5   : > { %p2978_p2 = pnand %p2976_p0, %p2973_p13 }
  0xa7   : > { %2981 = shalt.err (!%p2978_p2)
}
  0xa8   : > { %s2982_s21 = scalar_lea.vmem %s604_s28, 1024  ;;  %p2990_p9 = scmp.lt.s32.totalorder %s604_s28, %s604_s28 }
  0xa9   : > { %p2983_p4 = scmp.ne.s32.totalorder %s604_s28, %s2982_s21  ;;  %p2991_p10 = scmp.lt.s32.totalorder %s2982_s21, %s2982_s21 }
  0xab   : > { %p2985_p6 = pnand %p2983_p4, %p3684_p7  ;;  %p2992_p11 = por %p2991_p10, %p2990_p9 }
  0xad   : > { %p2986_p8 = pneg %p2985_p6 }
  0xaf   : > { %p2993_p12 = pnand %p2992_p11, %p2986_p8 }
  0xb1   : > { %2996 = shalt.err (!%p2993_p12)
}
  0xb2   : > { %s4456_s23 = smov 4   ;;  %s4457_s9 = smov 64  }
  0xb3   : > { %2627 = dma.hbm_to_vmem [thread:$0]  (!%p3668_p5), %s4455_s10, 1024, %s604_s28, [#allocation18], %s4457_s9, %s4457_s9, %s4456_s23  }
  0xb4   : > { %s4458_s11 = sld [smem:[#allocation64_spill]] }
  0xba   : > { %s2997_s27 = scalar_lea.hbm %s4458_s11, 16 }
  0xbb   : > { %p2998_p1 = scmp.ne.s32.totalorder %s4458_s11, %s2997_s27  ;;  %p3004_p0 = scmp.lt.u32.totalorder %s2997_s27, %s4458_s11 }
  0xbd   : > { %p3000_p3 = pnand %p2998_p1, %p3684_p7 }
  0xbf   : > { %p3001_p13 = pneg %p3000_p3 }
  0xc1   : > { %p3006_p2 = pnand %p3004_p0, %p3001_p13 }
  0xc3   : > { %3009 = shalt.err (!%p3006_p2)
}
  0xc4   : > { %s3010_s28 = scalar_lea.vmem %s3781_s26, 16  ;;  %s3017_s18 = scalar_lea.vmem %s3781_s26, 32 }
  0xc5   : > { %p3011_p4 = scmp.ne.s32.totalorder %s3781_s26, %s3010_s28  ;;  %p3018_p9 = scmp.lt.s32.totalorder %s3781_s26, %s3781_s26 }
  0xc6   : > { %p3019_p10 = scmp.lt.s32.totalorder %s3017_s18, %s3010_s28 }
  0xc7   : > { %p3013_p6 = pnand %p3011_p4, %p3684_p7 }
  0xc8   : > { %p3020_p11 = por %p3019_p10, %p3018_p9 }
  0xc9   : > { %p3014_p8 = pneg %p3013_p6 }
  0xcb   : > { %p3021_p12 = pnand %p3020_p11, %p3014_p8 }
  0xcd   : > { %3024 = shalt.err (!%p3021_p12)
}
  0xce   : > { %2630 = dma.hbm_to_vmem [thread:$0]  (!%p3668_p5), %s4458_s11, 16, %s3781_s26, [#allocation21]  }
  0xcf   : > { %s3515_s19 = smov [#allocation23]   ;;  %s3516_s27 = smov [#allocation26]  }
  0xd0   : > { %s641_s25 = sshll.u32 %s3515_s19, 4  ;;  %s665_s30 = sshll.u32 %s3516_s27, 4  ;;  %s642_s25 = int_to_ptr.vmem [resolvable:$true] %s641_s25  ;;  %s3828_s30 = int_to_ptr.vmem [resolvable:$true] %s665_s30 }
  0xd1   : > { %s3025_s28 = scalar_lea.hbm %s4394_s13, 16 }
  0xd2   : > { %p3026_p1 = scmp.ne.s32.totalorder %s4394_s13, %s3025_s28  ;;  %p3032_p0 = scmp.lt.u32.totalorder %s3025_s28, %s4394_s13 }
  0xd4   : > { %p3028_p3 = pnand %p3026_p1, %p3684_p7 }
  0xd6   : > { %p3029_p13 = pneg %p3028_p3 }
  0xd8   : > { %p3034_p2 = pnand %p3032_p0, %p3029_p13 }
  0xda   : > { %3037 = shalt.err (!%p3034_p2)
}
  0xdb   : > { %s3038_s29 = scalar_lea.vmem %s642_s25, 16  ;;  %s3045_s19 = scalar_lea.vmem %s642_s25, 32 }
  0xdc   : > { %p3039_p4 = scmp.ne.s32.totalorder %s642_s25, %s3038_s29  ;;  %p3046_p9 = scmp.lt.s32.totalorder %s642_s25, %s642_s25 }
  0xdd   : > { %p3047_p10 = scmp.lt.s32.totalorder %s3045_s19, %s3038_s29 }
  0xde   : > { %p3041_p6 = pnand %p3039_p4, %p3684_p7 }
  0xdf   : > { %p3048_p11 = por %p3047_p10, %p3046_p9 }
  0xe0   : > { %p3042_p8 = pneg %p3041_p6 }
  0xe2   : > { %p3049_p12 = pnand %p3048_p11, %p3042_p8 }
  0xe4   : > { %3052 = shalt.err (!%p3049_p12)
}
  0xe5   : > { %2636 = dma.hbm_to_vmem [thread:$0]  (!%p3668_p5), %s4394_s13, 16, %s642_s25, [#allocation24]  }
  0xe6   : > { %s3053_s28 = scalar_lea.hbm %s4396_s15, 16 }
  0xe7   : > { %p3054_p1 = scmp.ne.s32.totalorder %s4396_s15, %s3053_s28  ;;  %p3060_p0 = scmp.lt.u32.totalorder %s3053_s28, %s4396_s15 }
  0xe9   : > { %p3056_p3 = pnand %p3054_p1, %p3684_p7 }
  0xeb   : > { %p3057_p13 = pneg %p3056_p3 }
  0xed   : > { %p3062_p2 = pnand %p3060_p0, %p3057_p13 }
  0xef   : > { %3065 = shalt.err (!%p3062_p2)
}
  0xf0   : > { %s3066_s25 = scalar_lea.vmem %s3828_s30, 16  ;;  %s3073_s19 = scalar_lea.vmem %s3828_s30, 32 }
  0xf1   : > { %p3067_p4 = scmp.ne.s32.totalorder %s3828_s30, %s3066_s25  ;;  %p3074_p9 = scmp.lt.s32.totalorder %s3828_s30, %s3828_s30 }
  0xf2   : > { %p3075_p10 = scmp.lt.s32.totalorder %s3073_s19, %s3066_s25 }
  0xf3   : > { %p3069_p6 = pnand %p3067_p4, %p3684_p7 }
  0xf4   : > { %p3076_p11 = por %p3075_p10, %p3074_p9 }
  0xf5   : > { %p3070_p8 = pneg %p3069_p6 }
  0xf7   : > { %p3077_p12 = pnand %p3076_p11, %p3070_p8 }
  0xf9   : > { %3080 = shalt.err (!%p3077_p12)
}
  0xfa   : > { %2642 = dma.hbm_to_vmem [thread:$0]  (!%p3668_p5), %s4396_s15, 16, %s3828_s30, [#allocation27]  }
  0xfb   : > { %s3517_s20 = smov [#allocation7]   ;;  %s3518_s28 = smov [#allocation10]  }
  0xfc   : > { %s521_s21 = sshll.u32 %s3517_s20, 4  ;;  %s545_s18 = sshll.u32 %s3518_s28, 4  ;;  %s522_s21 = int_to_ptr.vmem [resolvable:$true] %s521_s21  ;;  %s3872_s18 = int_to_ptr.vmem [resolvable:$true] %s545_s18 }
  0xfd   : > { %s4459_s29 = sld [smem:[#allocation55_spill]] }
 0x103   : > { %s3081_s25 = scalar_lea.hbm %s4459_s29, 16 }
 0x104   : > { %p3082_p1 = scmp.ne.s32.totalorder %s4459_s29, %s3081_s25  ;;  %p3088_p0 = scmp.lt.u32.totalorder %s3081_s25, %s4459_s29 }
 0x106   : > { %p3084_p3 = pnand %p3082_p1, %p3684_p7 }
 0x108   : > { %p3085_p13 = pneg %p3084_p3 }
 0x10a   : > { %p3090_p2 = pnand %p3088_p0, %p3085_p13 }
 0x10c   : > { %3093 = shalt.err (!%p3090_p2)
}
 0x10d   : > { %s3094_s27 = scalar_lea.vmem %s522_s21, 16  ;;  %s3101_s20 = scalar_lea.vmem %s522_s21, 32 }
 0x10e   : > { %p3095_p4 = scmp.ne.s32.totalorder %s522_s21, %s3094_s27  ;;  %p3102_p9 = scmp.lt.s32.totalorder %s522_s21, %s522_s21 }
 0x10f   : > { %p3103_p10 = scmp.lt.s32.totalorder %s3101_s20, %s3094_s27 }
 0x110   : > { %p3097_p6 = pnand %p3095_p4, %p3684_p7 }
 0x111   : > { %p3104_p11 = por %p3103_p10, %p3102_p9 }
 0x112   : > { %p3098_p8 = pneg %p3097_p6 }
 0x114   : > { %p3105_p12 = pnand %p3104_p11, %p3098_p8 }
 0x116   : > { %3108 = shalt.err (!%p3105_p12)
}
 0x117   : > { %2606 = dma.hbm_to_vmem [thread:$0]  (!%p3668_p5), %s4459_s29, 16, %s522_s21, [#allocation6]  }
 0x118   : > { %s4460_s4 = sld [smem:[#allocation57_spill]] }
 0x11e   : > { %s3109_s25 = scalar_lea.hbm %s4460_s4, 16 }
 0x11f   : > { %p3110_p1 = scmp.ne.s32.totalorder %s4460_s4, %s3109_s25  ;;  %p3116_p0 = scmp.lt.u32.totalorder %s3109_s25, %s4460_s4 }
 0x121   : > { %p3112_p3 = pnand %p3110_p1, %p3684_p7 }
 0x123   : > { %p3113_p13 = pneg %p3112_p3 }
 0x125   : > { %p3118_p2 = pnand %p3116_p0, %p3113_p13 }
 0x127   : > { %3121 = shalt.err (!%p3118_p2)
}
 0x128   : > { %s3122_s21 = scalar_lea.vmem %s3872_s18, 16  ;;  %s3129_s20 = scalar_lea.vmem %s3872_s18, 32 }
 0x129   : > { %p3123_p4 = scmp.ne.s32.totalorder %s3872_s18, %s3122_s21  ;;  %p3130_p9 = scmp.lt.s32.totalorder %s3872_s18, %s3872_s18 }
 0x12a   : > { %p3131_p10 = scmp.lt.s32.totalorder %s3129_s20, %s3122_s21 }
 0x12b   : > { %p3125_p6 = pnand %p3123_p4, %p3684_p7 }
 0x12c   : > { %p3132_p11 = por %p3131_p10, %p3130_p9 }
 0x12d   : > { %p3126_p8 = pneg %p3125_p6 }
 0x12f   : > { %p3133_p12 = pnand %p3132_p11, %p3126_p8 }
 0x131   : > { %3136 = shalt.err (!%p3133_p12)
}
 0x132   : > { %2612 = dma.hbm_to_vmem [thread:$0]  (!%p3668_p5), %s4460_s4, 16, %s3872_s18, [#allocation9]  }
 0x133   : > { %s3519_s22 = smov [#allocation13]   ;;  %s3520_s25 = smov [#allocation16]  }
 0x134   : > { %s569_s26 = sshll.u32 %s3519_s22, 4  ;;  %s593_s19 = sshll.u32 %s3520_s25, 4  ;;  %s570_s26 = int_to_ptr.vmem [resolvable:$true] %s569_s26  ;;  %s3916_s19 = int_to_ptr.vmem [resolvable:$true] %s593_s19 }
 0x135   : > { %s4461_s6 = sld [smem:[#allocation59_spill]] }
 0x13b   : > { %s3137_s27 = scalar_lea.hbm %s4461_s6, 16 }
 0x13c   : > { %p3138_p1 = scmp.ne.s32.totalorder %s4461_s6, %s3137_s27  ;;  %p3144_p0 = scmp.lt.u32.totalorder %s3137_s27, %s4461_s6 }
 0x13e   : > { %p3140_p3 = pnand %p3138_p1, %p3684_p7 }
 0x140   : > { %p3141_p13 = pneg %p3140_p3 }
 0x142   : > { %p3146_p2 = pnand %p3144_p0, %p3141_p13 }
 0x144   : > { %3149 = shalt.err (!%p3146_p2)
}
 0x145   : > { %s3150_s28 = scalar_lea.vmem %s570_s26, 16  ;;  %s3157_s22 = scalar_lea.vmem %s570_s26, 32 }
 0x146   : > { %p3151_p4 = scmp.ne.s32.totalorder %s570_s26, %s3150_s28  ;;  %p3158_p9 = scmp.lt.s32.totalorder %s570_s26, %s570_s26 }
 0x147   : > { %p3159_p10 = scmp.lt.s32.totalorder %s3157_s22, %s3150_s28 }
 0x148   : > { %p3153_p6 = pnand %p3151_p4, %p3684_p7 }
 0x149   : > { %p3160_p11 = por %p3159_p10, %p3158_p9 }
 0x14a   : > { %p3154_p8 = pneg %p3153_p6 }
 0x14c   : > { %p3161_p12 = pnand %p3160_p11, %p3154_p8 }
 0x14e   : > { %3164 = shalt.err (!%p3161_p12)
}
 0x14f   : > { %2618 = dma.hbm_to_vmem [thread:$0]  (!%p3668_p5), %s4461_s6, 16, %s570_s26, [#allocation12]  }
 0x150   : > { %s4462_s8 = sld [smem:[#allocation61_spill]] }
 0x156   : > { %s3165_s21 = scalar_lea.hbm %s4462_s8, 32 }
 0x157   : > { %p3166_p1 = scmp.ne.s32.totalorder %s4462_s8, %s3165_s21  ;;  %p3172_p0 = scmp.lt.u32.totalorder %s3165_s21, %s4462_s8 }
 0x159   : > { %p3168_p3 = pnand %p3166_p1, %p3684_p7 }
 0x15b   : > { %p3169_p13 = pneg %p3168_p3 }
 0x15d   : > { %p3174_p2 = pnand %p3172_p0, %p3169_p13 }
 0x15f   : > { %3177 = shalt.err (!%p3174_p2)
}
 0x160   : > { %s3178_s26 = scalar_lea.vmem %s3916_s19, 32  ;;  %p3186_p9 = scmp.lt.s32.totalorder %s3916_s19, %s3916_s19 }
 0x161   : > { %p3179_p4 = scmp.ne.s32.totalorder %s3916_s19, %s3178_s26  ;;  %p3187_p10 = scmp.lt.s32.totalorder %s3178_s26, %s3178_s26 }
 0x163   : > { %p3181_p6 = pnand %p3179_p4, %p3684_p7  ;;  %p3188_p11 = por %p3187_p10, %p3186_p9 }
 0x165   : > { %p3182_p8 = pneg %p3181_p6 }
 0x167   : > { %p3189_p12 = pnand %p3188_p11, %p3182_p8 }
 0x169   : > { %3192 = shalt.err (!%p3189_p12)
}
 0x16a   : > { %2624 = dma.hbm_to_vmem [thread:$0]  (!%p3668_p5), %s4462_s8, 32, %s3916_s19, [#allocation15]  }
 0x16b   : > { %s3521_s0 = smov [#allocation22]   ;;  %s3522_s27 = smov [#allocation25]  }
 0x16c   : > { %s627_s30 = sshll.u32 %s3521_s0, 4  ;;  %s651_s21 = sshll.u32 %s3522_s27, 4  ;;  %s628_s30 = int_to_ptr.vmem [resolvable:$true] %s627_s30  ;;  %s3959_s21 = int_to_ptr.vmem [resolvable:$true] %s651_s21 }
 0x16d   : > { %s3193_s18 = scalar_lea.hbm %s4393_s12, 1024 }
 0x16e   : > { %p3194_p1 = scmp.ne.s32.totalorder %s4393_s12, %s3193_s18  ;;  %p3200_p0 = scmp.lt.u32.totalorder %s3193_s18, %s4393_s12 }
 0x170   : > { %p3196_p3 = pnand %p3194_p1, %p3684_p7 }
 0x172   : > { %p3197_p13 = pneg %p3196_p3 }
 0x174   : > { %p3202_p2 = pnand %p3200_p0, %p3197_p13 }
 0x176   : > { %3205 = shalt.err (!%p3202_p2)
}
 0x177   : > { %s3206_s25 = scalar_lea.vmem %s628_s30, 1024  ;;  %p3214_p9 = scmp.lt.s32.totalorder %s628_s30, %s628_s30 }
 0x178   : > { %p3207_p4 = scmp.ne.s32.totalorder %s628_s30, %s3206_s25  ;;  %p3215_p10 = scmp.lt.s32.totalorder %s3206_s25, %s3206_s25 }
 0x17a   : > { %p3209_p6 = pnand %p3207_p4, %p3684_p7  ;;  %p3216_p11 = por %p3215_p10, %p3214_p9 }
 0x17c   : > { %p3210_p8 = pneg %p3209_p6 }
 0x17e   : > { %p3217_p12 = pnand %p3216_p11, %p3210_p8 }
 0x180   : > { %3220 = shalt.err (!%p3217_p12)
}
 0x181   : > { %2633 = dma.hbm_to_vmem [thread:$0]  (!%p3668_p5), %s4393_s12, 1024, %s628_s30, [#allocation21], %s4457_s9, %s4457_s9, %s4456_s23  }
 0x182   : > { %s3221_s18 = scalar_lea.hbm %s4395_s14, 1024 }
 0x183   : > { %p3222_p1 = scmp.ne.s32.totalorder %s4395_s14, %s3221_s18  ;;  %p3228_p0 = scmp.lt.u32.totalorder %s3221_s18, %s4395_s14 }
 0x185   : > { %p3224_p3 = pnand %p3222_p1, %p3684_p7 }
 0x187   : > { %p3225_p13 = pneg %p3224_p3 }
 0x189   : > { %p3230_p2 = pnand %p3228_p0, %p3225_p13 }
 0x18b   : > { %3233 = shalt.err (!%p3230_p2)
}
 0x18c   : > { %s3234_s30 = scalar_lea.vmem %s3959_s21, 1024  ;;  %p3242_p9 = scmp.lt.s32.totalorder %s3959_s21, %s3959_s21 }
 0x18d   : > { %p3235_p4 = scmp.ne.s32.totalorder %s3959_s21, %s3234_s30  ;;  %p3243_p10 = scmp.lt.s32.totalorder %s3234_s30, %s3234_s30 }
 0x18f   : > { %p3237_p6 = pnand %p3235_p4, %p3684_p7  ;;  %p3244_p11 = por %p3243_p10, %p3242_p9 }
 0x191   : > { %p3238_p8 = pneg %p3237_p6 }
 0x193   : > { %p3245_p12 = pnand %p3244_p11, %p3238_p8 }
 0x195   : > { %3248 = shalt.err (!%p3245_p12)
}
 0x196   : > { %2639 = dma.hbm_to_vmem [thread:$0]  (!%p3668_p5), %s4395_s14, 1024, %s3959_s21, [#allocation24], %s4457_s9, %s4457_s9, %s4456_s23  }
 0x197   : > { %s3523_s27 = smov [#allocation28]   ;;  %s3524_s1 = smov [#allocation29]  }
 0x198   : > { %s675_s20 = sshll.u32 %s3523_s27, 4  ;;  %s689_s18 = sshll.u32 %s3524_s1, 4  ;;  %s676_s20 = int_to_ptr.vmem [resolvable:$true] %s675_s20  ;;  %s4008_s18 = int_to_ptr.vmem [resolvable:$true] %s689_s18 }
 0x199   : > { %s3249_s22 = scalar_lea.hbm %s4397_s16, 2048 }
 0x19a   : > { %p3250_p1 = scmp.ne.s32.totalorder %s4397_s16, %s3249_s22  ;;  %p3256_p0 = scmp.lt.u32.totalorder %s3249_s22, %s4397_s16 }
 0x19c   : > { %p3252_p3 = pnand %p3250_p1, %p3684_p7 }
 0x19e   : > { %p3253_p13 = pneg %p3252_p3 }
 0x1a0   : > { %p3258_p2 = pnand %p3256_p0, %p3253_p13 }
 0x1a2   : > { %3261 = shalt.err (!%p3258_p2)
}
 0x1a3   : > { %s3262_s9 = scalar_lea.vmem %s676_s20, 2048  ;;  %p3270_p9 = scmp.lt.s32.totalorder %s676_s20, %s676_s20 }
 0x1a4   : > { %p3263_p4 = scmp.ne.s32.totalorder %s676_s20, %s3262_s9  ;;  %p3271_p10 = scmp.lt.s32.totalorder %s3262_s9, %s3262_s9 }
 0x1a6   : > { %p3265_p6 = pnand %p3263_p4, %p3684_p7  ;;  %p3272_p11 = por %p3271_p10, %p3270_p9 }
 0x1a8   : > { %p3266_p8 = pneg %p3265_p6 }
 0x1aa   : > { %p3273_p12 = pnand %p3272_p11, %p3266_p8 }
 0x1ac   : > { %3276 = shalt.err (!%p3273_p12)
}
 0x1ad   : > { %s4463_s21 = smov 8   ;;  %s4464_s0 = smov 128  }
 0x1ae   : > { %2645 = dma.hbm_to_vmem [thread:$0]  (!%p3668_p5), %s4397_s16, 2048, %s676_s20, [#allocation27], %s4464_s0, %s4464_s0, %s4463_s21  }
 0x1af   : > { %s3277_s22 = scalar_lea.hbm %s4398_s17, 32 }
 0x1b0   : > { %p3278_p1 = scmp.ne.s32.totalorder %s4398_s17, %s3277_s22  ;;  %p3284_p0 = scmp.lt.u32.totalorder %s3277_s22, %s4398_s17 }
 0x1b2   : > { %p3280_p3 = pnand %p3278_p1, %p3684_p7 }
 0x1b4   : > { %p3281_p13 = pneg %p3280_p3 }
 0x1b6   : > { %p3286_p2 = pnand %p3284_p0, %p3281_p13 }
 0x1b8   : > { %3289 = shalt.err (!%p3286_p2)
}
 0x1b9   : > { %s3290_s20 = scalar_lea.vmem %s4008_s18, 32  ;;  %p3298_p9 = scmp.lt.s32.totalorder %s4008_s18, %s4008_s18 }
 0x1ba   : > { %p3291_p4 = scmp.ne.s32.totalorder %s4008_s18, %s3290_s20  ;;  %p3299_p10 = scmp.lt.s32.totalorder %s3290_s20, %s3290_s20 }
 0x1bc   : > { %p3293_p6 = pnand %p3291_p4, %p3684_p7  ;;  %p3300_p11 = por %p3299_p10, %p3298_p9 }
 0x1be   : > { %p3294_p8 = pneg %p3293_p6 }
 0x1c0   : > { %p3301_p12 = pnand %p3300_p11, %p3294_p8 }
 0x1c2   : > { %3304 = shalt.err (!%p3301_p12)
}
 0x1c3   : > { %s4465_s0 = sld [smem:[#allocation50_spill]]  ;;  %s4466_s27 = sld [smem:[#allocation49_spill]] }
 0x1c4   : > { %s4467_s1 = sld [smem:[#allocation48_spill]]  ;;  %s4468_s24 = sld [smem:[#allocation47_spill]] }
 0x1c5   : > { %s4469_s28 = sld [smem:[#allocation51_spill]]  ;;  %s4477_s6 = sld [smem:[#allocation62_spill]] }
 0x1c6   : > { %2648 = dma.hbm_to_vmem [thread:$0]  (!%p3668_p5), %s4398_s17, 32, %s4008_s18, [#allocation30]  }
 0x1c9   : > { %s2233_s3 = sadd.s32 4294967294, %s4465_s0   ;;  %s4056_s21 = sadd.s32 1, %s4465_s0  }
 0x1ca   : > { %s54_s26 = ssub.s32 %s4465_s0, %s4056_s21  ;;  %s57_s22 = sadd.s32 1, %s4466_s27 }
 0x1cb   : > { %p55_p7 = scmp.eq.s32.totalorder %s54_s26, 0  ;;  %p64_p1 = scmp.ne.s32.totalorder %s4466_s27, %s4467_s1 }
 0x1cc   : > { %p65_p3 = scmp.eq.s32.totalorder %s4465_s0, 0  ;;  %p70_p13 = scmp.ne.s32.totalorder %s4467_s1, %s4468_s24 }
 0x1cd   : > { %s4067_s19 = scalar_select %p55_p7, %s4466_s27, %s57_s22  }
 0x1ce   : > { %p4069_p0 = por %p65_p3, %p64_p1  ;;  %p4471_p2 = scmp.eq.s32.totalorder %s4469_s28, 0 }
 0x1cf   : > { %p456_p4 = scmp.eq.s32.totalorder %s4469_s28, 2  ;;  %p462_p6 = scmp.eq.s32.totalorder %s2233_s3, 2 }
 0x1d0   : > { %p4075_p5 = por %p4471_p2, %p70_p13  ;;  %p2679_p8 = scmp.lt.s32.totalorder %s4465_s0, 3 }
 0x1d1   : > { %s700_s25 = sand.u32 1, %s4466_s27   ;;  %p4082_p9 = por %p456_p4, %p64_p1 }
 0x1d2   : > { %s4472_s18 = scalar_select %p4075_p5, 1, 0 }
 0x1d3   : > { %s4473_s23 = scalar_select %p4082_p9, 1, 0 }
 0x1d4   : > { %p4086_p10 = por %p462_p6, %p70_p13  ;;  %s4090_s9 = sshll.u32 %s700_s25, 3 }
 0x1d5   : > { %s2380_s1 = sshll.u32 %s4465_s0, 7  ;;  %s4475_s22 = sld [smem:[#allocation53_spill]] }
 0x1d6   : > { %s4474_s20 = scalar_select %p4086_p10, 1, 0 }
 0x1d7   : > { %s704_s27 = scalar_lea.vmem [#allocation2], %s4090_s9  ;;  %p4103_p11 = pnand %p2679_p8, %p4069_p0 }
 0x1d8   : > { %s712_s28 = sshll.u32 %s704_s27, 4  ;;  %s4110_s24 = scalar_lea.hbm %s4477_s6, %s2380_s1  ;;  %s4099_s28 = int_to_ptr.vmem [resolvable:$true] %s712_s28 }
 0x1d9   : > { %s719_s26 = sand.u32 1, %s4465_s0   ;;  %s701_s7 = scalar_lea.sflag [#allocation3], %s700_s25 }
 0x1da   : > { %p3307_p7 = pneg %p4103_p11 }
 0x1db   : > { %s4096_s2 = scalar_lea.hbm %s4475_s22, %s2380_s1  ;;  %s3310_s10 = scalar_lea.hbm %s4475_s22, 384 }
 0x1dc   : > { %s3305_s8 = scalar_lea.hbm %s4096_s2, 128  ;;  %p3311_p13 = scmp.lt.u32.totalorder %s4096_s2, %s4475_s22 }
 0x1dd   : > { %p3306_p12 = scmp.ne.s32.totalorder %s4096_s2, %s3305_s8  ;;  %p3312_p0 = scmp.lt.u32.totalorder %s3310_s10, %s3305_s8 }
 0x1de   : > { %p3314_p4 = scmp.lt.u32.totalorder %s3305_s8, %s4096_s2 }
 0x1df   : > { %p3308_p1 = pnand %p3307_p7, %p3306_p12  ;;  %p3313_p2 = por %p3312_p0, %p3311_p13 }
 0x1e1   : > { %p3309_p3 = pneg %p3308_p1  ;;  %p3315_p6 = por %p3314_p4, %p3313_p2 }
 0x1e3   : > { %p3316_p8 = pnand %p3315_p6, %p3309_p3 }
 0x1e5   : > { %3319 = shalt.err (!%p3316_p8)
}
 0x1e6   : > { %s3320_s5 = scalar_lea.vmem %s4099_s28, 128  ;;  %s3525_s25 = smov [#allocation2]  }
 0x1e7   : > { %p3321_p12 = scmp.ne.s32.totalorder %s4099_s28, %s3320_s5  ;;  %s3325_s1 = sshll.u32 %s3525_s25, 4  ;;  %s3326_s1 = int_to_ptr.vmem [resolvable:$false] %s3325_s1 }
 0x1e8   : > { %s3327_s11 = scalar_lea.vmem %s3326_s1, 256  ;;  %p3328_p9 = scmp.lt.s32.totalorder %s4099_s28, %s3326_s1 }
 0x1e9   : > { %p3323_p1 = pnand %p3321_p12, %p3307_p7  ;;  %p3329_p13 = scmp.lt.s32.totalorder %s3327_s11, %s3320_s5 }
 0x1eb   : > { %p3324_p10 = pneg %p3323_p1  ;;  %p3330_p0 = por %p3329_p13, %p3328_p9 }
 0x1ed   : > { %p3331_p2 = pnand %p3330_p0, %p3324_p10 }
 0x1ef   : > { %3334 = shalt.err (!%p3331_p2)
}
 0x1f0   : > { %2652 = dma.hbm_to_vmem [thread:$0]  (!%p4103_p11), %s4096_s2, 128, %s4099_s28, %s701_s7  }
 0x1f1   : > { %s723_s8 = scalar_lea.vmem [#allocation17], %s4090_s9  ;;  %s720_s30 = scalar_lea.sflag [#allocation18], %s719_s26 }
 0x1f2   : > { %s730_s10 = sshll.u32 %s723_s8, 4  ;;  %s3335_s27 = scalar_lea.hbm %s4110_s24, 128  ;;  %s731_s10 = int_to_ptr.vmem [resolvable:$true] %s730_s10 }
 0x1f3   : > { %p3336_p9 = scmp.ne.s32.totalorder %s4110_s24, %s3335_s27  ;;  %s3340_s25 = scalar_lea.hbm %s4477_s6, 384 }
 0x1f4   : > { %p3341_p4 = scmp.lt.u32.totalorder %s4110_s24, %s4477_s6  ;;  %p3342_p6 = scmp.lt.u32.totalorder %s3340_s25, %s3335_s27 }
 0x1f5   : > { %p3338_p10 = pnand %p3336_p9, %p3307_p7  ;;  %p3344_p12 = scmp.lt.u32.totalorder %s3335_s27, %s4110_s24 }
 0x1f6   : > { %p3343_p8 = por %p3342_p6, %p3341_p4 }
 0x1f7   : > { %p3339_p3 = pneg %p3338_p10 }
 0x1f8   : > { %p3345_p1 = por %p3344_p12, %p3343_p8 }
 0x1fa   : > { %p3346_p13 = pnand %p3345_p1, %p3339_p3 }
 0x1fc   : > { %3349 = shalt.err (!%p3346_p13)
}
 0x1fd   : > { %s3350_s7 = scalar_lea.vmem %s731_s10, 128  ;;  %s3526_s2 = smov [#allocation17]  }
 0x1fe   : > { %p3351_p0 = scmp.ne.s32.totalorder %s731_s10, %s3350_s7  ;;  %s3355_s0 = sshll.u32 %s3526_s2, 4  ;;  %s3356_s0 = int_to_ptr.vmem [resolvable:$false] %s3355_s0 }
 0x1ff   : > { %s3357_s9 = scalar_lea.vmem %s3356_s0, 256  ;;  %p3358_p10 = scmp.lt.s32.totalorder %s731_s10, %s3356_s0 }
 0x200   : > { %p3353_p2 = pnand %p3351_p0, %p3307_p7  ;;  %p3359_p5 = scmp.lt.s32.totalorder %s3357_s9, %s3350_s7 }
 0x202   : > { %p3354_p9 = pneg %p3353_p2  ;;  %p3360_p4 = por %p3359_p5, %p3358_p10 }
 0x204   : > { %p3361_p6 = pnand %p3360_p4, %p3354_p9 }
 0x206   : > { %3364 = shalt.err (!%p3361_p6)
}
 0x207   : > { %2655 = dma.hbm_to_vmem [thread:$0]  (!%p4103_p11), %s4110_s24, 128, %s731_s10, %s720_s30  }
 0x208   : > { %s4478_s28 = sld [smem:[#allocation52_spill]] }
 0x20e   : > { %p4479_p3 = scmp.ne.s32.totalorder %s4478_s28, 0 }
 0x20f   : > { %s4480_s26 = sld [smem:[#allocation48_spill]] (!%p4479_p3)  ;;  %p4481_p5 = scmp.ne.s32.totalorder (!%p4479_p3), %s4472_s18, 0 }
 0x210   : > { %739 = sbr.rel (%p4479_p3) target bundleno = 2400 (0x960), region = 92 }
 0x215   : > { %s4163_s8 = sand.u32 (!%p4479_p3), 1, %s4480_s26  }
 0x216   : > { %s2258_s27 = sshll.u32 (!%p4479_p3), %s4163_s8, 3  ;;  %s742_s4 = scalar_lea.sflag (!%p4479_p3), [#allocation3], %s4163_s8 }
 0x217   : > { %s4167_s5 = scalar_lea.vmem [#allocation2], %s2258_s27 }
 0x218   : > { %3438 = dma.done.wait (%p4481_p5), %s742_s4, 128  }
 0x219   : > { %3440 = vsyncadd (%p4481_p5), %s742_s4, 4294967168  ;;  %s4482_s3 = sld [smem:[#allocation51_spill]] }
 0x21f   : > { %p4483_p11 = scmp.eq.s32.totalorder %s4482_s3, 0 }
 0x221   : > { %3442 = dma.done.wait (%p4483_p11), [#allocation6], 1616   ;;  %p4484_p7 = pmov %p4483_p11 }
 0x223   : > { %3444 = vsyncadd (%p4484_p7), [#allocation6], 4294965680  ;;  %p4485_p8 = pmov %p4484_p7 }
 0x224   : > { %p4486_p12 = pmov %p4484_p7 }
 0x225   : > { %3446 = dma.done.wait (%p4485_p8), [#allocation9], 1040  }
 0x226   : > { %3448 = vsyncadd (%p4486_p12), [#allocation9], 4294966256  ;;  %p4487_p1 = pmov %p4484_p7 }
 0x228   : > { %3450 = dma.done.wait (%p4487_p1), [#allocation12], 1040   ;;  %p4488_p13 = pmov %p4487_p1 }
 0x229   : > { %p4489_p0 = pmov %p4487_p1 }
 0x22a   : > { %3452 = vsyncadd (%p4488_p13), [#allocation12], 4294966256 }
 0x22b   : > { %3454 = dma.done.wait (%p4489_p0), [#allocation15], 2080   ;;  %p4490_p2 = pmov %p4489_p0 }
 0x22c   : > { %s782_s24 = sand.u32 1, %s4482_s3   ;;  %s4190_s30 = scalar_lea.vmem [#allocation17], %s2258_s27 }
 0x22d   : > { %3456 = vsyncadd (%p4490_p2), [#allocation15], 4294965216  ;;  %s783_s10 = scalar_lea.sflag [#allocation18], %s782_s24 }
 0x22e   : > { %3458 = dma.done.wait (%p4481_p5), %s783_s10, 128  }
 0x22f   : > { %3460 = vsyncadd (%p4481_p5), %s783_s10, 4294967168  ;;  %p4491_p9 = pmov %p4489_p0 }
 0x230   : > { %p4492_p10 = pmov %p4489_p0 }
 0x231   : > { %3462 = dma.done.wait (%p4491_p9), [#allocation18], 1024  }
 0x232   : > { %3464 = vsyncadd (%p4492_p10), [#allocation18], 4294966272  ;;  %p4493_p4 = pmov %p4489_p0 }
 0x233   : > { %p4494_p6 = pmov %p4489_p0 }
 0x234   : > { %3466 = dma.done.wait (%p4493_p4), [#allocation21], 1040  }
 0x235   : > { %3468 = vsyncadd (%p4494_p6), [#allocation21], 4294966256  ;;  %p4495_p3 = pmov %p4489_p0 }
 0x236   : > { %p4496_p11 = pmov %p4489_p0 }
 0x237   : > { %3470 = dma.done.wait (%p4495_p3), [#allocation24], 1040  }
 0x238   : > { %3472 = vsyncadd (%p4496_p11), [#allocation24], 4294966256  ;;  %p4497_p5 = pmov %p4489_p0 }
 0x239   : > { %p4498_p7 = pmov %p4489_p0 }
 0x23a   : > { %3474 = dma.done.wait (%p4497_p5), [#allocation27], 2064  }
 0x23b   : > { %3476 = vsyncadd (%p4498_p7), [#allocation27], 4294965232  ;;  %p4499_p8 = pmov %p4489_p0 }
 0x23c   : > { %p4500_p12 = pmov %p4489_p0 }
 0x23d   : > { %3478 = dma.done.wait (%p4499_p8), [#allocation30], 32  }
 0x23e   : > { %3480 = vsyncadd (%p4500_p12), [#allocation30], 4294967264  ;;  %v3527_v0 = vmov 0   ;;  %v3528_v1 = vmov 0.0   ;;  %v2752_v2 = vld [vmem:[#allocation5] sm:$0xff]   ;;  %v2753_v3 = vld [vmem:[#allocation5 + $0x8] sm:$0xff]  }
 0x23f   : > { %1006 = vmatprep.subr.bf16.mxu0 %v3527_v0  ;;  %2428 = vmatprep.subr.bf16.mxu1 %v3528_v1  ;;  %v2754_v4 = vld [vmem:[#allocation5 + $0x10] sm:$0xff]   ;;  %v2755_v5 = vld [vmem:[#allocation5 + $0x18] sm:$0xff]   ;;  %vm998_vm0 = vcmask 588800   ;;  %v2767_v8 = vld [vmem:[#allocation8] sm:$0xff]   ;;  %vm1002_vm1 = vcmask 1043456   ;;  %vm3529_vm2 = vmmov 0  }
 0x240   : > { %1007 = vmatpush1.bf16.msra.mxu0 %v2752_v2  ;;  %v884_v6 = vld [vmem:[%s4167_s5] sm:$0xff]  ;;  %v2756_v9 = vld [vmem:[#allocation5 + $0x20] sm:$0xff]   ;;  %2429 = vmatpush3.bf16.msra.mxu1 %v2767_v8  ;;  %v2757_v11 = vld [vmem:[#allocation5 + $0x28] sm:$0xff]   ;;  %s2276_s18 = sshll.u32 %s4163_s8, 4  ;;  %s2381_s1 = sshll.u32 %s4482_s3, 8 }
 0x241   : > { %1008 = vmatprep.subr.bf16.mxu0 %v3527_v0  ;;  %v2280_v7 = vcombine.high %v884_v6, %v884_v6  ;;  %v2768_v10 = vld [vmem:[#allocation8 + $0x8] sm:$0xff]   ;;  %2430 = vmatprep.subr.bf16.mxu1 %v3528_v1  ;;  %v2769_v12 = vld [vmem:[#allocation8 + $0x10] sm:$0xff]   ;;  %v2770_v14 = vld [vmem:[#allocation8 + $0x18] sm:$0xff]   ;;  %v2279_v24 = vcombine.low %v884_v6, %v884_v6  ;;  %s4283_s25 = scalar_lea.vmem [#allocation32], %s2276_s18  ;;  %s4501_s2 = sld [smem:[#allocation66_spill]] }
 0x242   : > { %v2758_v13 = vld [vmem:[#allocation5 + $0x30] sm:$0xff]   ;;  %v2759_v15 = vld [vmem:[#allocation5 + $0x38] sm:$0xff]   ;;  %v2771_v16 = vld [vmem:[#allocation8 + $0x20] sm:$0xff]   ;;  %2444 = vmatprep.mubr.msk.bf16.mxu1 %vm3529_vm2, %v3528_v1  ;;  %s1956_s9 = sshll.u32 %s4283_s25, 4  ;;  %s1928_s28 = scalar_lea.sflag [#allocation33], %s4163_s8  ;;  %s1957_s9 = int_to_ptr.vmem [resolvable:$true] %s1956_s9 }
 0x243   : > { %2294 = vmatprep.mubr.msk.bf16.mxu0 %vm998_vm0, %v2280_v7  ;;  %v2760_v17 = vld [vmem:[#allocation5 + $0x40] sm:$0xff]   ;;  %v2772_v18 = vld [vmem:[#allocation8 + $0x28] sm:$0xff]   ;;  %v2763_v21 = vld [vmem:[#allocation5 + $0x58] sm:$0xff]   ;;  %s3365_s26 = scalar_lea.vmem %s1957_s9, 256  ;;  %p4502_p13 = scmp.ne.s32.totalorder %s4473_s23, 0 }
 0x244   : > { %1009 = vmatpush1.bf16.msra.mxu0 %v2753_v3  ;;  %2431 = vmatpush3.bf16.msra.mxu1 %v2768_v10  ;;  %v2761_v19 = vld [vmem:[#allocation5 + $0x48] sm:$0xff]   ;;  %v2762_v20 = vld [vmem:[#allocation5 + $0x50] sm:$0xff]   ;;  %v2764_v22 = vld [vmem:[#allocation5 + $0x60] ss:$0 sps:$4 sm:$0xff]   ;;  %p3366_p1 = scmp.ne.s32.totalorder %s1957_s9, %s3365_s26  ;;  %s3530_s27 = smov [#allocation32]  }
 0x245   : > { %1010 = vmatprep.subr.bf16.mxu0 %v3527_v0  ;;  %2432 = vmatprep.subr.bf16.mxu1 %v3528_v1  ;;  %v1004_v23 = vsel %vm1002_vm1, %v2764_v22, 0  ;;  %v2773_v25 = vld [vmem:[#allocation8 + $0x30] sm:$0xff]   ;;  %v2774_v26 = vld [vmem:[#allocation8 + $0x38] sm:$0xff]   ;;  %v2775_v34 = vld [vmem:[#allocation11] sm:$0xff]   ;;  %s3369_s4 = sshll.u32 %s3530_s27, 4  ;;  %s3370_s4 = int_to_ptr.vmem [resolvable:$false] %s3369_s4 }
 0x246   : > { %v2278_v27 = vld [vmem:[#allocation7] ss:$0 sm:$0xff]  ;;  %v2776_v36 = vld [vmem:[#allocation11 + $0x8] sm:$0xff]   ;;  %v2777_v37 = vld [vmem:[#allocation11 + $0x10] sm:$0xff]   ;;  %p3367_p0 = pnand %p3366_p1, %p4502_p13  ;;  %s3371_s5 = scalar_lea.vmem %s3370_s4, 512 }
 0x247   : > { %v2778_v38 = vld [vmem:[#allocation11 + $0x18] sm:$0xff]   ;;  %v2779_v39 = vld [vmem:[#allocation11 + $0x20] sm:$0xff]   ;;  %v2780_v40 = vld [vmem:[#allocation11 + $0x28] sm:$0xff]   ;;  %s4305_s0 = scalar_lea.hbm %s4501_s2, %s2381_s1  ;;  %p3372_p9 = scmp.lt.s32.totalorder %s1957_s9, %s3370_s4 }
 0x248   : > { %1011 = vmatpush1.bf16.msra.mxu0 %v2754_v4  ;;  %2433 = vmatpush3.bf16.msra.mxu1 %v2769_v12  ;;  %v2781_v41 = vld [vmem:[#allocation11 + $0x30] sm:$0xff]   ;;  %v2782_v42 = vld [vmem:[#allocation11 + $0x38] sm:$0xff]   ;;  %v2783_v43 = vld [vmem:[#allocation14] ss:$8 sps:$4 sm:$0xff]   ;;  %p3368_p2 = pneg %p3367_p0  ;;  %p3373_p10 = scmp.lt.s32.totalorder %s3371_s5, %s3365_s26 }
 0x249   : > { %1012 = vmatprep.subr.bf16.mxu0 %v3527_v0  ;;  %2434 = vmatprep.subr.bf16.mxu1 %v3528_v1  ;;  %v2785_v44 = vld [vmem:[#allocation14 + $0x4] ss:$8 sps:$4 sm:$0xff]   ;;  %v2788_v45 = vld [vmem:[#allocation14 + $0x14] ss:$8 sps:$4 sm:$0xff]   ;;  %v2786_v46 = vld [vmem:[#allocation14 + $0x10] ss:$8 sps:$4 sm:$0xff]  }
 0x24a   : > { %v2791_v47 = vld [vmem:[#allocation14 + $0x24] ss:$8 sps:$4 sm:$0xff]   ;;  %v2789_v48 = vld [vmem:[#allocation14 + $0x20] ss:$8 sps:$4 sm:$0xff]   ;;  %v2794_v49 = vld [vmem:[#allocation14 + $0x34] ss:$8 sps:$4 sm:$0xff]   ;;  %p3374_p4 = por %p3373_p10, %p3372_p9 }
 0x24b   : > { %v2792_v50 = vld [vmem:[#allocation14 + $0x30] ss:$8 sps:$4 sm:$0xff]   ;;  %v2797_v51 = vld [vmem:[#allocation14 + $0x44] ss:$8 sps:$4 sm:$0xff]   ;;  %v2795_v52 = vld [vmem:[#allocation14 + $0x40] ss:$8 sps:$4 sm:$0xff]  }
 0x24c   : > { %1013 = vmatpush1.bf16.msra.mxu0 %v2755_v5  ;;  %2435 = vmatpush3.bf16.msra.mxu1 %v2770_v14  ;;  %v2800_v53 = vld [vmem:[#allocation14 + $0x54] ss:$8 sps:$4 sm:$0xff]   ;;  %v2798_v54 = vld [vmem:[#allocation14 + $0x50] ss:$8 sps:$4 sm:$0xff]   ;;  %v2803_v55 = vld [vmem:[#allocation14 + $0x64] ss:$8 sps:$4 sm:$0xff]   ;;  %p3375_p6 = pnand %p3374_p4, %p3368_p2 }
 0x24d   : > { %1014 = vmatprep.subr.bf16.mxu0 %v3527_v0  ;;  %2436 = vmatprep.subr.bf16.mxu1 %v3528_v1  ;;  %v2801_v56 = vld [vmem:[#allocation14 + $0x60] ss:$8 sps:$4 sm:$0xff]   ;;  %v2295_v57 = vld [vmem:[#allocation10] ss:$0 sm:$0xff]  ;;  %v2804_v4 = vld [vmem:[#allocation14 + $0x70] ss:$8 sps:$4 sm:$0xff]  }
 0x24e   : > { %v2806_v3 = vld [vmem:[#allocation14 + $0x74] ss:$8 sps:$4 sm:$0xff]  }
 0x24f   : > { %v2807_v5 = vld [vmem:[#allocation19] sm:$0xff]   ;;  %v2808_v6 = vld [vmem:[#allocation19 + $0x8] sm:$0xff]  }
 0x250   : > { %1015 = vmatpush1.bf16.msra.mxu0 %v2756_v9  ;;  %2437 = vmatpush3.bf16.msra.mxu1 %v2771_v16  ;;  %v2304_v7 = vld [vmem:[#allocation13] ss:$0 sm:$0xff]  ;;  %v2810_v16 = vld [vmem:[#allocation19 + $0x18] sm:$0xff]  }
 0x251   : > { %1016 = vmatprep.subr.bf16.mxu0 %v3527_v0  ;;  %2438 = vmatprep.subr.bf16.mxu1 %v3528_v1  ;;  %v2816_v22 = vld [vmem:[#allocation22 + $0x8] sm:$0xff]  }
 0x254   : > { %1017 = vmatpush1.bf16.msra.mxu0 %v2757_v11  ;;  %2439 = vmatpush3.bf16.msra.mxu1 %v2772_v18  ;;  %v2812_v18 = vld [vmem:[#allocation19 + $0x28] sm:$0xff]  }
 0x255   : > { %1018 = vmatprep.subr.bf16.mxu0 %v3527_v0  ;;  %2440 = vmatprep.subr.bf16.mxu1 %v3528_v1 }
 0x258   : > { %1019 = vmatpush1.bf16.msra.mxu0 %v2758_v13  ;;  %2441 = vmatpush3.bf16.msra.mxu1 %v2773_v25  ;;  %v2819_v25 = vld [vmem:[#allocation22 + $0x20] sm:$0xff]  }
 0x259   : > { %1020 = vmatprep.subr.bf16.mxu0 %v3527_v0  ;;  %2442 = vmatprep.subr.bf16.mxu1 %v3528_v1 }
 0x25c   : > { %1021 = vmatpush1.bf16.msra.mxu0 %v2759_v15  ;;  %2443 = vmatpush3.bf16.msra.mxu1 %v2774_v26  ;;  %v2809_v15 = vld [vmem:[#allocation19 + $0x10] sm:$0xff]  }
 0x25d   : > { %1022 = vmatprep.subr.bf16.mxu0 %v3527_v0  ;;  %2448 = vmatprep.subr.bf16.mxu1 %v3528_v1  ;;  %v2820_v26 = vld [vmem:[#allocation22 + $0x28] sm:$0xff]  }
 0x260   : > { %1023 = vmatpush1.bf16.msra.mxu0 %v2760_v17  ;;  %v2811_v17 = vld [vmem:[#allocation19 + $0x20] sm:$0xff]  }
 0x261   : > { %1024 = vmatprep.subr.bf16.mxu0 %v3527_v0 }
 0x264   : > { %1025 = vmatpush1.bf16.msra.mxu0 %v2761_v19  ;;  %v2813_v19 = vld [vmem:[#allocation19 + $0x30] sm:$0xff]  }
 0x265   : > { %1026 = vmatprep.subr.bf16.mxu0 %v3527_v0 }
 0x268   : > { %1027 = vmatpush1.bf16.msra.mxu0 %v2762_v20  ;;  %v2814_v20 = vld [vmem:[#allocation19 + $0x38] sm:$0xff]  }
 0x269   : > { %1028 = vmatprep.subr.bf16.mxu0 %v3527_v0 }
 0x26c   : > { %1029 = vmatpush1.bf16.msra.mxu0 %v2763_v21  ;;  %v2815_v21 = vld [vmem:[#allocation22] sm:$0xff]  }
 0x26d   : > { %1030 = vmatprep.subr.bf16.mxu0 %v3527_v0 }
 0x270   : > { %1031 = vmatpush1.bf16.msra.mxu0 %v1004_v23  ;;  %v2817_v23 = vld [vmem:[#allocation22 + $0x10] sm:$0xff]  }
 0x271   : > { %1382 = vmatprep.subr.bf16.mxu0 %v2785_v44 }
 0x273   : > { %1039 = vmatmul.mubr.bf16.vlgmr.msra.gmra.mrb[0].mxu0 %v2279_v24  ;;  %v2818_v24 = vld [vmem:[#allocation22 + $0x18] sm:$0xff]  }
 0x274   : > { %1414 = vmatprep.mubr.bf16.mxu0 %v3527_v0  ;;  %1383 = vmatpush1.bf16.msra.mxu0 %v2783_v43 }
 0x275   : > { %1384 = vmatprep.subr.bf16.mxu0 %v2788_v45 }
 0x278   : > { %1385 = vmatpush1.bf16.msra.mxu0 %v2786_v46 }
 0x279   : > { %1386 = vmatprep.subr.bf16.mxu0 %v2791_v47  ;;  %v2821_v47 = vld [vmem:[#allocation22 + $0x30] sm:$0xff]  }
 0x27c   : > { %1387 = vmatpush1.bf16.msra.mxu0 %v2789_v48  ;;  %v2822_v48 = vld [vmem:[#allocation22 + $0x38] sm:$0xff]  }
 0x27d   : > { %1388 = vmatprep.subr.bf16.mxu0 %v2794_v49  ;;  %v2823_v49 = vld [vmem:[#allocation25] sm:$0xff]  }
 0x280   : > { %1389 = vmatpush1.bf16.msra.mxu0 %v2792_v50  ;;  %v2824_v50 = vld [vmem:[#allocation25 + $0x8] sm:$0xff]  }
 0x281   : > { %1390 = vmatprep.subr.bf16.mxu0 %v2797_v51  ;;  %v2825_v51 = vld [vmem:[#allocation25 + $0x10] sm:$0xff]  }
 0x284   : > { %1391 = vmatpush1.bf16.msra.mxu0 %v2795_v52  ;;  %v2826_v52 = vld [vmem:[#allocation25 + $0x18] sm:$0xff]  }
 0x285   : > { %1392 = vmatprep.subr.bf16.mxu0 %v2800_v53  ;;  %v2827_v53 = vld [vmem:[#allocation25 + $0x20] sm:$0xff]  }
 0x288   : > { %1393 = vmatpush1.bf16.msra.mxu0 %v2798_v54  ;;  %v2828_v54 = vld [vmem:[#allocation25 + $0x28] sm:$0xff]  }
 0x289   : > { %1394 = vmatprep.subr.bf16.mxu0 %v2803_v55  ;;  %v2329_v55 = vld [vmem:[#allocation20] ss:$0 sm:$0xff] }
 0x28c   : > { %1395 = vmatpush1.bf16.msra.mxu0 %v2801_v56 }
 0x28d   : > { %1396 = vmatprep.subr.bf16.mxu0 %v2806_v3  ;;  %v2831_v3 = vld [vmem:[#allocation28] ss:$8 sps:$4 sm:$0xff]  }
 0x290   : > { %1397 = vmatpush1.bf16.msra.mxu0 %v2804_v4  ;;  %v2833_v4 = vld [vmem:[#allocation28 + $0x4] ss:$8 sps:$4 sm:$0xff]  }
 0x291   : > { %2488 = vmatprep.subr.bf16.mxu0 %v3528_v1 }
 0x346   : > { %v1040_v28 = vpop.f32.mrb[0].mxu0 }
 0x347   : > { %v1041_v29 = vadd.f32 %v2278_v27, %v1040_v28  ;;  %v1042_v30 = vpop.f32.mrb[1].mxu0  ;;  %v1292_v27 = vlaneseq }
 0x348   : > { %v1043_v31 = vpop.f32.mrb[2].mxu0  ;;  %v1290_v30 = vld [vmem:[#allocation16] sm:$0x3] }
 0x349   : > { %v1046_v32 = vmax.f32 %v1041_v29, 0.0  ;;  %v1044_v33 = vpop.f32.mrb[3].mxu0  ;;  %v4272_v28 = vshrl.u32 %v1292_v27, 7 }
 0x34b   : > { %v1047_v35 = vpack.c.bf16 %v1046_v32, %v1046_v32  ;;  %v1294_v29 = vsub.s32 0, %v4272_v28  ;;  %v1298_v31 = vsub.s32 1, %v4272_v28 }
 0x34d   : > { %2445 = vmatmul.mubr.bf16.vlgmr.msra.gmra.mrb[0].mxu1 %v1047_v35  ;;  %v1295_v32 = vrot.slane %v1290_v30, %v1294_v29  ;;  %v1299_v33 = vrot.slane %v1290_v30, %v1298_v31 }
 0x34e   : > { %2449 = vmatpush3.bf16.msra.mxu1 %v2775_v34  ;;  %2464 = vmatprep.mubr.msk.bf16.mxu1 %vm3529_vm2, %v3528_v1 }
 0x34f   : > { %2450 = vmatprep.subr.bf16.mxu1 %v3528_v1 }
 0x352   : > { %2451 = vmatpush3.bf16.msra.mxu1 %v2776_v36 }
 0x353   : > { %2452 = vmatprep.subr.bf16.mxu1 %v3528_v1 }
 0x356   : > { %2453 = vmatpush3.bf16.msra.mxu1 %v2777_v37 }
 0x357   : > { %2454 = vmatprep.subr.bf16.mxu1 %v3528_v1 }
 0x35a   : > { %2455 = vmatpush3.bf16.msra.mxu1 %v2778_v38 }
 0x35b   : > { %2456 = vmatprep.subr.bf16.mxu1 %v3528_v1 }
 0x35e   : > { %2457 = vmatpush3.bf16.msra.mxu1 %v2779_v39 }
 0x35f   : > { %2458 = vmatprep.subr.bf16.mxu1 %v3528_v1 }
 0x362   : > { %2459 = vmatpush3.bf16.msra.mxu1 %v2780_v40 }
 0x363   : > { %2460 = vmatprep.subr.bf16.mxu1 %v3528_v1 }
 0x366   : > { %2461 = vmatpush3.bf16.msra.mxu1 %v2781_v41 }
 0x367   : > { %2462 = vmatprep.subr.bf16.mxu1 %v3528_v1 }
 0x36a   : > { %2463 = vmatpush3.bf16.msra.mxu1 %v2782_v42  ;;  %v1428_v42 = vld [vmem:[%s4190_s30] sm:$0xff] }
 0x36b   : > { %2468 = vmatprep.subr.bf16.mxu1 %v3528_v1 }
 0x420   : > { %v1153_v58 = vpop.f32.mrb[0].mxu1 }
 0x421   : > { %v1154_v59 = vadd.f32 %v2295_v57, %v1153_v58  ;;  %v2446_v60 = vpop.f32.mrb[1].mxu1 }
 0x422   : > { %v1156_v61 = vpop.f32.mrb[2].mxu1 }
 0x423   : > { %v1159_v62 = vmax.f32 %v1154_v59, 0.0  ;;  %v2447_v63 = vpop.f32.mrb[3].mxu1 }
 0x424   : > { %v2829_v63 = vld [vmem:[#allocation25 + $0x30] sm:$0xff]  }
 0x425   : > { %v1160_v2 = vpack.c.bf16 %v1159_v62, %v1159_v62 }
 0x427   : > { %2465 = vmatmul.mubr.bf16.vlgmr.msra.gmra.mrb[4].mxu1 %v1160_v2  ;;  %v2830_v2 = vld [vmem:[#allocation25 + $0x38] sm:$0xff]  }
 0x428   : > { %2484 = vmatprep.mubr.msk.bf16.mxu1 %vm3529_vm2, %v3528_v1  ;;  %2469 = vmatpush3.bf16.msra.mxu1 %v2807_v5  ;;  %v2836_v5 = vld [vmem:[#allocation28 + $0x14] ss:$8 sps:$4 sm:$0xff]  }
 0x429   : > { %2470 = vmatprep.subr.bf16.mxu1 %v3528_v1 }
 0x42c   : > { %2471 = vmatpush3.bf16.msra.mxu1 %v2808_v6  ;;  %v2834_v6 = vld [vmem:[#allocation28 + $0x10] ss:$8 sps:$4 sm:$0xff]  }
 0x42d   : > { %2472 = vmatprep.subr.bf16.mxu1 %v3528_v1 }
 0x430   : > { %2473 = vmatpush3.bf16.msra.mxu1 %v2809_v15  ;;  %v2338_v15 = vld [vmem:[#allocation23] ss:$0 sm:$0xff] }
 0x431   : > { %2474 = vmatprep.subr.bf16.mxu1 %v3528_v1 }
 0x434   : > { %2475 = vmatpush3.bf16.msra.mxu1 %v2810_v16 }
 0x435   : > { %2476 = vmatprep.subr.bf16.mxu1 %v3528_v1 }
 0x438   : > { %2477 = vmatpush3.bf16.msra.mxu1 %v2811_v17 }
 0x439   : > { %2478 = vmatprep.subr.bf16.mxu1 %v3528_v1 }
 0x43c   : > { %2479 = vmatpush3.bf16.msra.mxu1 %v2812_v18 }
 0x43d   : > { %2480 = vmatprep.subr.bf16.mxu1 %v3528_v1 }
 0x440   : > { %2481 = vmatpush3.bf16.msra.mxu1 %v2813_v19 }
 0x441   : > { %2482 = vmatprep.subr.bf16.mxu1 %v3528_v1 }
 0x444   : > { %2483 = vmatpush3.bf16.msra.mxu1 %v2814_v20 }
 0x445   : > { %2508 = vmatprep.subr.bf16.mxu1 %v3528_v1 }
 0x4fa   : > { %v1266_v8 = vpop.f32.mrb[4].mxu1 }
 0x4fb   : > { %v1267_v9 = vadd.f32 %v2304_v7, %v1266_v8  ;;  %v2466_v10 = vpop.f32.mrb[5].mxu1  ;;  %v2839_v7 = vld [vmem:[#allocation28 + $0x24] ss:$8 sps:$4 sm:$0xff]   ;;  %v2837_v8 = vld [vmem:[#allocation28 + $0x20] ss:$8 sps:$4 sm:$0xff]  }
 0x4fc   : > { %v1269_v11 = vpop.f32.mrb[6].mxu1  ;;  %v2845_v10 = vld [vmem:[#allocation28 + $0x44] ss:$8 sps:$4 sm:$0xff]  }
 0x4fd   : > { %v1272_v12 = vmax.f32 %v1267_v9, 0.0  ;;  %v2467_v13 = vpop.f32.mrb[7].mxu1  ;;  %v2842_v9 = vld [vmem:[#allocation28 + $0x34] ss:$8 sps:$4 sm:$0xff]  }
 0x4fe   : > { %v2848_v11 = vld [vmem:[#allocation28 + $0x54] ss:$8 sps:$4 sm:$0xff]   ;;  %v2851_v13 = vld [vmem:[#allocation28 + $0x64] ss:$8 sps:$4 sm:$0xff]  }
 0x4ff   : > { %v1273_v14 = vpack.c.bf16 %v1272_v12, %v1272_v12  ;;  %v2846_v12 = vld [vmem:[#allocation28 + $0x50] ss:$8 sps:$4 sm:$0xff]  }
 0x501   : > { %1415 = vmatmul.mubr.bf16.vlgmr.msra.gmra.mrb[4].mxu0 %v1273_v14  ;;  %v2849_v14 = vld [vmem:[#allocation28 + $0x60] ss:$8 sps:$4 sm:$0xff]  }
 0x502   : > { %2504 = vmatprep.mubr.msk.bf16.mxu0 %vm3529_vm2, %v3528_v1  ;;  %2489 = vmatpush3.bf16.msra.mxu0 %v2815_v21 }
 0x503   : > { %2490 = vmatprep.subr.bf16.mxu0 %v3528_v1 }
 0x506   : > { %2491 = vmatpush3.bf16.msra.mxu0 %v2816_v22 }
 0x507   : > { %2492 = vmatprep.subr.bf16.mxu0 %v3528_v1 }
 0x50a   : > { %2493 = vmatpush3.bf16.msra.mxu0 %v2817_v23  ;;  %v2854_v23 = vld [vmem:[#allocation28 + $0x74] ss:$8 sps:$4 sm:$0xff]  }
 0x50b   : > { %2494 = vmatprep.subr.bf16.mxu0 %v3528_v1 }
 0x50e   : > { %2495 = vmatpush3.bf16.msra.mxu0 %v2818_v24  ;;  %v2852_v24 = vld [vmem:[#allocation28 + $0x70] ss:$8 sps:$4 sm:$0xff]  }
 0x50f   : > { %2496 = vmatprep.subr.bf16.mxu0 %v3528_v1 }
 0x512   : > { %2497 = vmatpush3.bf16.msra.mxu0 %v2819_v25  ;;  %v2347_v25 = vld [vmem:[#allocation26] ss:$0 sm:$0xff] }
 0x513   : > { %2498 = vmatprep.subr.bf16.mxu0 %v3528_v1 }
 0x516   : > { %2499 = vmatpush3.bf16.msra.mxu0 %v2820_v26 }
 0x517   : > { %2500 = vmatprep.subr.bf16.mxu0 %v3528_v1 }
 0x51a   : > { %2501 = vmatpush3.bf16.msra.mxu0 %v2821_v47 }
 0x51b   : > { %2502 = vmatprep.subr.bf16.mxu0 %v3528_v1 }
 0x51e   : > { %2503 = vmatpush3.bf16.msra.mxu0 %v2822_v48 }
 0x51f   : > { %1879 = vmatprep.subr.bf16.mxu0 %v2833_v4 }
 0x5d4   : > { %v1416_v34 = vpop.f32.mrb[4].mxu0 }
 0x5d5   : > { %v1417_v35 = vadd.f32 %v1416_v34, %v1295_v32  ;;  %v1418_v36 = vpop.f32.mrb[5].mxu0 }
 0x5d6   : > { %v1419_v37 = vadd.f32 %v1418_v36, %v1299_v33  ;;  %v1420_v38 = vpop.f32.mrb[6].mxu0 }
 0x5d7   : > { %1423 = vst [vmem:[%s4283_s25] sm:$0xff] %v1417_v35  ;;  %v1421_v39 = vpop.f32.mrb[7].mxu0 }
 0x5d8   : > { %1424 = vst [vmem:[%s4283_s25 + $0x8] sm:$0xff] %v1419_v37  ;;  %v1425_v40 = vmul.f32 0.5, %v1419_v37 }
 0x5da   : > { %v1426_v41 = vmul.f32 1.442695, %v1425_v40 }
 0x5dc   : > { %2855 = vpow2.f32 %v1426_v41 }
 0x5e6   : > { %v2856_v43 = vpop.eup %2855 }
 0x5e7   : > { %v1429_v44 = vmul.f32 %v2856_v43, %v1428_v42 }
 0x5e9   : > { %v1430_v45 = vadd.f32 %v1429_v44, %v1417_v35 }
 0x5eb   : > { %v1431_v46 = vpack.c.bf16 %v1430_v45, %v1430_v45 }
 0x5ed   : > { %2485 = vmatmul.mubr.bf16.vlgmr.msra.gmra.mrb[8].mxu1 %v1431_v46 }
 0x5ee   : > { %2524 = vmatprep.mubr.msk.bf16.mxu1 %vm3529_vm2, %v3528_v1  ;;  %2509 = vmatpush3.bf16.msra.mxu1 %v2823_v49 }
 0x5ef   : > { %2510 = vmatprep.subr.bf16.mxu1 %v3528_v1 }
 0x5f2   : > { %2511 = vmatpush3.bf16.msra.mxu1 %v2824_v50 }
 0x5f3   : > { %2512 = vmatprep.subr.bf16.mxu1 %v3528_v1 }
 0x5f6   : > { %2513 = vmatpush3.bf16.msra.mxu1 %v2825_v51 }
 0x5f7   : > { %2514 = vmatprep.subr.bf16.mxu1 %v3528_v1 }
 0x5fa   : > { %2515 = vmatpush3.bf16.msra.mxu1 %v2826_v52 }
 0x5fb   : > { %2516 = vmatprep.subr.bf16.mxu1 %v3528_v1 }
 0x5fe   : > { %2517 = vmatpush3.bf16.msra.mxu1 %v2827_v53 }
 0x5ff   : > { %2518 = vmatprep.subr.bf16.mxu1 %v3528_v1 }
 0x602   : > { %2519 = vmatpush3.bf16.msra.mxu1 %v2828_v54 }
 0x603   : > { %2520 = vmatprep.subr.bf16.mxu1 %v3528_v1 }
 0x606   : > { %2521 = vmatpush3.bf16.msra.mxu1 %v2829_v63 }
 0x607   : > { %2522 = vmatprep.subr.bf16.mxu1 %v3528_v1  ;;  %v2843_v1 = vld [vmem:[#allocation28 + $0x40] ss:$8 sps:$4 sm:$0xff]  }
 0x60a   : > { %2523 = vmatpush3.bf16.msra.mxu1 %v2830_v2 }
 0x6c0   : > { %v1537_v56 = vpop.f32.mrb[8].mxu1 }
 0x6c1   : > { %v1538_v57 = vadd.f32 %v2329_v55, %v1537_v56  ;;  %v2486_v58 = vpop.f32.mrb[9].mxu1 }
 0x6c2   : > { %v1540_v59 = vpop.f32.mrb[10].mxu1 }
 0x6c3   : > { %v1543_v60 = vmax.f32 %v1538_v57, 0.0  ;;  %v2487_v61 = vpop.f32.mrb[11].mxu1 }
 0x6c5   : > { %v1544_v62 = vpack.c.bf16 %v1543_v60, %v1543_v60 }
 0x6c7   : > { %2505 = vmatmul.mubr.bf16.vlgmr.msra.gmra.mrb[8].mxu0 %v1544_v62 }
 0x6c8   : > { %1911 = vmatprep.mubr.bf16.mxu0 %v3527_v0  ;;  %1880 = vmatpush1.bf16.msra.mxu0 %v2831_v3  ;;  %v2840_v0 = vld [vmem:[#allocation28 + $0x30] ss:$8 sps:$4 sm:$0xff]  }
 0x6c9   : > { %1881 = vmatprep.subr.bf16.mxu0 %v2836_v5 }
 0x6cc   : > { %1882 = vmatpush1.bf16.msra.mxu0 %v2834_v6 }
 0x6cd   : > { %1883 = vmatprep.subr.bf16.mxu0 %v2839_v7 }
 0x6d0   : > { %1884 = vmatpush1.bf16.msra.mxu0 %v2837_v8 }
 0x6d1   : > { %1885 = vmatprep.subr.bf16.mxu0 %v2842_v9 }
 0x6d4   : > { %1886 = vmatpush1.bf16.msra.mxu0 %v2840_v0 }
 0x6d5   : > { %1887 = vmatprep.subr.bf16.mxu0 %v2845_v10 }
 0x6d8   : > { %1888 = vmatpush1.bf16.msra.mxu0 %v2843_v1 }
 0x6d9   : > { %1889 = vmatprep.subr.bf16.mxu0 %v2848_v11 }
 0x6dc   : > { %1890 = vmatpush1.bf16.msra.mxu0 %v2846_v12 }
 0x6dd   : > { %1891 = vmatprep.subr.bf16.mxu0 %v2851_v13 }
 0x6e0   : > { %1892 = vmatpush1.bf16.msra.mxu0 %v2849_v14 }
 0x6e1   : > { %1893 = vmatprep.subr.bf16.mxu0 %v2854_v23 }
 0x6e4   : > { %1894 = vmatpush1.bf16.msra.mxu0 %v2852_v24 }
 0x79a   : > { %v1650_v16 = vpop.f32.mrb[8].mxu0 }
 0x79b   : > { %v1651_v17 = vadd.f32 %v2338_v15, %v1650_v16  ;;  %v2506_v18 = vpop.f32.mrb[9].mxu0 }
 0x79c   : > { %v1653_v19 = vpop.f32.mrb[10].mxu0 }
 0x79d   : > { %v1656_v20 = vmax.f32 %v1651_v17, 0.0  ;;  %v2507_v21 = vpop.f32.mrb[11].mxu0 }
 0x79f   : > { %v1657_v22 = vpack.c.bf16 %v1656_v20, %v1656_v20 }
 0x7a1   : > { %2525 = vmatmul.mubr.bf16.vlgmr.msra.gmra.mrb[12].mxu1 %v1657_v22 }
 0x874   : > { %v1763_v26 = vpop.f32.mrb[12].mxu1 }
 0x875   : > { %v1764_v27 = vadd.f32 %v2347_v25, %v1763_v26  ;;  %v2526_v30 = vpop.f32.mrb[13].mxu1 }
 0x876   : > { %v1766_v32 = vpop.f32.mrb[14].mxu1 }
 0x877   : > { %v1769_v33 = vmax.f32 %v1764_v27, 0.0  ;;  %v2527_v34 = vpop.f32.mrb[15].mxu1 }
 0x879   : > { %v1770_v35 = vpack.c.bf16 %v1769_v33, %v1769_v33 }
 0x87b   : > { %1912 = vmatmul.mubr.bf16.vlgmr.msra.gmra.mrb[12].mxu0 %v1770_v35 }
 0x87c   : > { %3378 = shalt.err (!%p3375_p6)
}
 0x87d   : > { %s3379_s24 = scalar_lea.hbm %s4305_s0, 256  ;;  %s3383_s25 = scalar_lea.hbm %s4501_s2, 768 }
 0x87e   : > { %p3380_p3 = scmp.ne.s32.totalorder %s4305_s0, %s3379_s24  ;;  %p3384_p7 = scmp.lt.u32.totalorder %s4305_s0, %s4501_s2 }
 0x87f   : > { %p3385_p8 = scmp.lt.u32.totalorder %s3383_s25, %s3379_s24  ;;  %p3387_p1 = scmp.lt.u32.totalorder %s3379_s24, %s4305_s0 }
 0x880   : > { %p3381_p11 = pnand %p3380_p3, %p4502_p13 }
 0x881   : > { %p3386_p12 = por %p3385_p8, %p3384_p7 }
 0x882   : > { %p3382_p5 = pneg %p3381_p11 }
 0x883   : > { %p3388_p0 = por %p3387_p1, %p3386_p12 }
 0x885   : > { %p3389_p2 = pnand %p3388_p0, %p3382_p5 }
 0x887   : > { %3392 = shalt.err (!%p3389_p2)
}
 0x888   : > { %2597 = dma.vmem_to_hbm [thread:$0]  (%p4502_p13), %s1957_s9, 256, %s4305_s0, %s1928_s28   ;;  %v1787_v36 = vld [vmem:[#allocation29] sm:$0x3] }
 0x889   : > { %v1792_v37 = vrot.slane %v1787_v36, %v1294_v29  ;;  %v1796_v38 = vrot.slane %v1787_v36, %v1298_v31  ;;  %s875_s26 = scalar_lea.vmem [#allocation31], %s2276_s18  ;;  %s4503_s9 = sld [smem:[#allocation65_spill]] }
 0x88a   : > { %s1942_s27 = sshll.u32 %s875_s26, 4  ;;  %s1923_s18 = scalar_lea.sflag [#allocation4], %s4163_s8  ;;  %s4339_s27 = int_to_ptr.vmem [resolvable:$true] %s1942_s27 }
 0x88b   : > { %s3393_s5 = scalar_lea.vmem %s4339_s27, 256  ;;  %s3531_s3 = smov [#allocation31]  }
 0x88c   : > { %p3394_p9 = scmp.ne.s32.totalorder %s4339_s27, %s3393_s5  ;;  %s3397_s24 = sshll.u32 %s3531_s3, 4  ;;  %s3398_s24 = int_to_ptr.vmem [resolvable:$false] %s3397_s24 }
 0x88d   : > { %p3400_p6 = scmp.lt.s32.totalorder %s4339_s27, %s3398_s24 }
 0x88e   : > { %p3395_p10 = pnand %p3394_p9, %p4502_p13 }
 0x88f   : > { %s4337_s28 = scalar_lea.hbm %s4503_s9, %s2381_s1  ;;  %s3399_s1 = scalar_lea.vmem %s3398_s24, 512 }
 0x890   : > { %p3396_p4 = pneg %p3395_p10  ;;  %p3401_p3 = scmp.lt.s32.totalorder %s3399_s1, %s3393_s5 }
 0x892   : > { %p3402_p11 = por %p3401_p3, %p3400_p6 }
 0x894   : > { %p3403_p5 = pnand %p3402_p11, %p3396_p4 }
 0x94e   : > { %v1913_v39 = vpop.f32.mrb[12].mxu0 }
 0x94f   : > { %v1914_v40 = vadd.f32 %v1913_v39, %v1792_v37  ;;  %v1915_v41 = vpop.f32.mrb[13].mxu0 }
 0x950   : > { %v1916_v42 = vadd.f32 %v1915_v41, %v1796_v38  ;;  %v1917_v43 = vpop.f32.mrb[14].mxu0 }
 0x951   : > { %1920 = vst [vmem:[%s875_s26] sm:$0xff] %v1914_v40  ;;  %v1918_v28 = vpop.f32.mrb[15].mxu0 }
 0x952   : > { %1921 = vst.msk [vmem:[%s875_s26 + $0x8] sm:$0xff] %vm998_vm0, %v1916_v42 }
 0x953   : > { %3406 = shalt.err (!%p3403_p5)
}
 0x954   : > { %s3407_s8 = scalar_lea.hbm %s4337_s28, 256  ;;  %s3411_s25 = scalar_lea.hbm %s4503_s9, 768 }
 0x955   : > { %p3408_p7 = scmp.ne.s32.totalorder %s4337_s28, %s3407_s8  ;;  %p3412_p1 = scmp.lt.u32.totalorder %s4337_s28, %s4503_s9 }
 0x956   : > { %p3413_p0 = scmp.lt.u32.totalorder %s3411_s25, %s3407_s8  ;;  %p3415_p9 = scmp.lt.u32.totalorder %s3407_s8, %s4337_s28 }
 0x957   : > { %p3409_p8 = pnand %p3408_p7, %p4502_p13 }
 0x958   : > { %p3414_p2 = por %p3413_p0, %p3412_p1 }
 0x959   : > { %p3410_p12 = pneg %p3409_p8 }
 0x95a   : > { %p3416_p10 = por %p3415_p9, %p3414_p2 }
 0x95c   : > { %p3417_p4 = pnand %p3416_p10, %p3410_p12 }
 0x95e   : > { %3420 = shalt.err (!%p3417_p4)
}
 0x95f   : > { %2596 = dma.vmem_to_hbm [thread:$0]  (%p4502_p13), %s4339_s27, 256, %s4337_s28, %s1923_s18  }
 0x960 PF: > { %s4504_s26 = sld [smem:[#allocation50_spill]]  ;;  %s4505_s4 = sld [smem:[#allocation47_spill]] }
 0x961   : > { %p4506_p3 = scmp.ne.s32.totalorder %s4474_s20, 0 }
 0x966   : > { %p2696_p6 = scmp.ge.s32.totalorder %s4504_s26, 2  ;;  %s1968_s0 = sand.u32 1, %s4505_s4  }
 0x967   : > { %s1969_s5 = scalar_lea.sflag [#allocation4], %s1968_s0 }
 0x968   : > { %p2657_p11 = pnand %p2696_p6, %p4506_p3 }
 0x96a   : > { %3482 = dma.done.wait (!%p2657_p11), %s1969_s5, 256  }
 0x96b   : > { %3484 = vsyncadd (!%p2657_p11), %s1969_s5, 4294967040  ;;  %s1978_s3 = scalar_lea.sflag [#allocation33], %s1968_s0 }
 0x96c   : > { %3486 = dma.done.wait (!%p2657_p11), %s1978_s3, 256  }
 0x96d   : > { %3488 = vsyncadd (!%p2657_p11), %s1978_s3, 4294967040  ;;  %s4507_s0 = sld [smem:[#allocation48_spill]]  ;;  %s4508_s30 = sld [smem:[#allocation49_spill]] }
 0x96e   : > { %p47_p13 = scmp.ge.s32.totalorder %s4056_s21, 5   ;;  %s4509_s20 = smov %s4067_s19 }
 0x970   :  { %49 = sbr.rel (!%p47_p13) target bundleno = 32 (0x20), region = 231 }
 0x977   :  { %1983 = vsyncpa [#allocation3], 1 }
 0x978   :  { %1985 = vsyncpa [#allocation3 + $0x1], 1 }
 0x979   :  { %1986 = vsyncpa [#allocation6], 1 }
 0x97a   :  { %1987 = vsyncpa [#allocation9], 1 }
 0x97b   :  { %1988 = vsyncpa [#allocation12], 1 }
 0x97c   :  { %1989 = vsyncpa [#allocation15], 1 }
 0x97d   :  { %1990 = vsyncpa [#allocation18], 1 }
 0x97e   :  { %1992 = vsyncpa [#allocation18 + $0x1], 1 }
 0x97f   :  { %1993 = vsyncpa [#allocation21], 1 }
 0x980   :  { %1994 = vsyncpa [#allocation24], 1 }
 0x981   :  { %1995 = vsyncpa [#allocation27], 1 }
 0x982   :  { %1996 = vsyncpa [#allocation30], 1 }
 0x983   :  { %1997 = vsyncpa [#allocation4], 1 }
 0x984   :  { %1999 = vsyncpa [#allocation4 + $0x1], 1 }
 0x985   :  { %2000 = vsyncpa [#allocation33], 1 }
 0x986   :  { %2002 = vsyncpa [#allocation33 + $0x1], 1 }

</bundles_post_ra>
